<compile_context>
chip_gen: v7x
topology: tpu7x:2x2x1
jax: 0.10.0
libtpu: 0.0.40
codegen_flags: <defaults>
</compile_context>

<pallas_src>
import math
import numpy as np

import jax
import jax.numpy as jnp
from jax.experimental import pallas as pl
from jax.experimental.pallas import tpu as pltpu  # noqa: F401  (TPU backend)

# ----------------------------- config ---------------------------------------
BATCH = 2
SEQ = 8
HIDDEN = 32
NUM_HEADS = 4
NUM_KV_HEADS = 2
HEAD_DIM = HIDDEN // NUM_HEADS            # 8
N_REP = NUM_HEADS // NUM_KV_HEADS         # grouped-query repeat factor (2)
Q_WIDTH = NUM_HEADS * HEAD_DIM            # 32
KV_WIDTH = NUM_KV_HEADS * HEAD_DIM        # 16
ROPE_THETA = 10000.0
ATTENTION_DROPOUT = 0.0                   # eval mode -> dropout is identity
NEG_INF = -1e30
SM_SCALE = 1.0 / math.sqrt(HEAD_DIM)


# ----------------------------- fused Pallas kernel ---------------------------
def _fused_gqa_kernel(x_ref, wqkv_ref, wo_ref,
                      qcos_ref, qsin_ref, kcos_ref, ksin_ref,
                      *out_refs):
    """Whole GQA forward for all (batch, head) pairs in one invocation.

    x:       (B*S, HIDDEN)
    wqkv:    (HIDDEN, 2*Q_WIDTH + 3*KV_WIDTH)  = [Wq^T | Wk^T | Wv^T | Wq^T@Rq | Wk^T@Rk]
    wo:      (HIDDEN, HIDDEN)                  = Wo^T
    qcos/qsin: (B*S, Q_WIDTH)   RoPE tables tiled per head, pre-scaled by 1/sqrt(D)
    kcos/ksin: (B*S, KV_WIDTH)  RoPE tables tiled per kv head
    outputs: [optional attn weights (B, H, S, S)], attn output (B, S, HIDDEN)
    """
    if len(out_refs) == 2:
        w_ref, o_ref = out_refs
    else:
        (o_ref,) = out_refs
        w_ref = None

    # Single fused projection matmul (Q, K, V and their rotate_half partners).
    qkv = jnp.dot(x_ref[...], wqkv_ref[...],
                  preferred_element_type=jnp.float32)            # (B*S, 112)
    q2 = qkv[:, 0:Q_WIDTH]                                        # (B*S, 32)
    k2 = qkv[:, Q_WIDTH:Q_WIDTH + KV_WIDTH]                       # (B*S, 16)
    v2 = qkv[:, Q_WIDTH + KV_WIDTH:Q_WIDTH + 2 * KV_WIDTH]        # (B*S, 16)
    qrot2 = qkv[:, Q_WIDTH + 2 * KV_WIDTH:2 * Q_WIDTH + 2 * KV_WIDTH]
    krot2 = qkv[:, 2 * Q_WIDTH + 2 * KV_WIDTH:]

    # RoPE, element-wise (softmax scale already folded into qcos/qsin).
    q2 = q2 * qcos_ref[...] + qrot2 * qsin_ref[...]               # (B*S, 32)
    k2 = k2 * kcos_ref[...] + krot2 * ksin_ref[...]               # (B*S, 16)

    wo = wo_ref[...]                                              # (32, 32)

    # Causal mask generated in-kernel (module has is_causal=True).
    # TODO(synk): padded / arbitrary attention_mask inputs are not supported.
    row = jax.lax.broadcasted_iota(jnp.int32, (SEQ, SEQ), 0)
    col = jax.lax.broadcasted_iota(jnp.int32, (SEQ, SEQ), 1)
    causal = jnp.where(col <= row, 0.0, NEG_INF).astype(jnp.float32)

    # Statically unrolled loop over (batch, kv-group, repeat) -> no grid-step
    # overhead; everything stays in vregs.
    for b in range(BATCH):
        rows = slice(b * SEQ, (b + 1) * SEQ)
        out_acc = jnp.zeros((SEQ, HIDDEN), jnp.float32)
        for g in range(NUM_KV_HEADS):
            kcols = slice(g * HEAD_DIM, (g + 1) * HEAD_DIM)
            k_bg = k2[rows, kcols]                                # (S, D)
            v_bg = v2[rows, kcols]                                # (S, D)
            for r in range(N_REP):
                h = g * N_REP + r        # grouped-query: head h uses kv head h//N_REP
                qcols = slice(h * HEAD_DIM, (h + 1) * HEAD_DIM)
                q_bh = q2[rows, qcols]                            # (S, D), pre-scaled
                s = jnp.dot(q_bh, k_bg.T,
                            preferred_element_type=jnp.float32) + causal
                s = s - jnp.max(s, axis=-1, keepdims=True)
                p = jnp.exp(s)
                p = p * pl.reciprocal(jnp.sum(p, axis=-1, keepdims=True),
                                      approx=False)
                # attention_dropout = 0.0 (eval) -> identity.
                if w_ref is not None:
                    w_ref[b, h, :, :] = p.astype(w_ref.dtype)
                o_bh = jnp.dot(p, v_bg, preferred_element_type=jnp.float32)
                # Output projection folded per head: out += o_h @ Wo^T[hD:(h+1)D, :]
                out_acc = out_acc + jnp.dot(
                    o_bh, wo[h * HEAD_DIM:(h + 1) * HEAD_DIM, :],
                    preferred_element_type=jnp.float32)
        o_ref[b, :, :] = out_acc.astype(o_ref.dtype)


# ----------------------------- host-side helpers -----------------------------
def rope_cos_sin(position_ids, head_dim, theta):
    # TODO(synk): reference __init__ computes 1/(base * (arange/dim)) which divides
    # by zero at index 0; we use the standard Llama inv_freq = 1/(base**(i/dim)).
    inv_freq = 1.0 / (theta ** (jnp.arange(0, head_dim, 2, dtype=jnp.float32) / head_dim))
    freqs = position_ids[:, :, None].astype(jnp.float32) * inv_freq[None, None, :]
    emb = jnp.concatenate([freqs, freqs], axis=-1)                # (B, S, D)
    return jnp.cos(emb), jnp.sin(emb)


def _rotate_half_matrix(n_heads, head_dim):
    """Block-diagonal signed permutation R such that (x @ R) == rotate_half(x)
    applied independently to each head's D-wide block (exact, entries in {0,+-1})."""
    half = head_dim // 2
    r = np.zeros((head_dim, head_dim), dtype=np.float32)
    for i in range(half):
        r[i + half, i] = -1.0        # col i          <- -x[:, i + half]
        r[i, i + half] = 1.0         # col i + half   <-  x[:, i]
    return jnp.asarray(np.kron(np.eye(n_heads, dtype=np.float32), r))


def llama_gqa_forward(hidden_states, params, position_ids, output_attention=True):
    """Fused forward (eval mode, no KV cache). Returns (attn_weights or None, output)."""
    B, S, H = hidden_states.shape
    x2d = hidden_states.reshape(B * S, H)

    # nn.Linear weights are (out, in); the kernel consumes (in, out).
    wq_t, wk_t, wv_t, wo_t = (params["wq"].T, params["wk"].T,
                              params["wv"].T, params["wo"].T)

    # Fold the per-head rotate_half into the projection weights (exact).
    rq = _rotate_half_matrix(NUM_HEADS, HEAD_DIM)
    rk = _rotate_half_matrix(NUM_KV_HEADS, HEAD_DIM)
    wqkv = jnp.concatenate([wq_t, wk_t, wv_t, wq_t @ rq, wk_t @ rk], axis=1)  # (32, 112)

    # RoPE tables tiled per head; fold the 1/sqrt(head_dim) scale into the q side.
    cos, sin = rope_cos_sin(position_ids, HEAD_DIM, ROPE_THETA)   # (B, S, D)
    cos2 = cos.reshape(B * S, HEAD_DIM)
    sin2 = sin.reshape(B * S, HEAD_DIM)
    qcos = jnp.tile(cos2, (1, NUM_HEADS)) * SM_SCALE              # (B*S, 32)
    qsin = jnp.tile(sin2, (1, NUM_HEADS)) * SM_SCALE
    kcos = jnp.tile(cos2, (1, NUM_KV_HEADS))                      # (B*S, 16)
    ksin = jnp.tile(sin2, (1, NUM_KV_HEADS))

    in_specs = [
        pl.BlockSpec((B * S, H), lambda: (0, 0)),
        pl.BlockSpec(wqkv.shape, lambda: (0, 0)),
        pl.BlockSpec((H, H), lambda: (0, 0)),
        pl.BlockSpec((B * S, Q_WIDTH), lambda: (0, 0)),
        pl.BlockSpec((B * S, Q_WIDTH), lambda: (0, 0)),
        pl.BlockSpec((B * S, KV_WIDTH), lambda: (0, 0)),
        pl.BlockSpec((B * S, KV_WIDTH), lambda: (0, 0)),
    ]

    if output_attention:
        out_shape = (jax.ShapeDtypeStruct((B, NUM_HEADS, S, S), jnp.float32),
                     jax.ShapeDtypeStruct((B, S, H), jnp.float32))
        out_specs = (pl.BlockSpec((B, NUM_HEADS, S, S), lambda: (0, 0, 0, 0)),
                     pl.BlockSpec((B, S, H), lambda: (0, 0, 0)))
    else:
        out_shape = jax.ShapeDtypeStruct((B, S, H), jnp.float32)
        out_specs = pl.BlockSpec((B, S, H), lambda: (0, 0, 0))

    result = pl.pallas_call(
        _fused_gqa_kernel,
        out_shape=out_shape,
        in_specs=in_specs,
        out_specs=out_specs,
    )(x2d, wqkv, wo_t, qcos, qsin, kcos, ksin)

    if output_attention:
        attn_w, out = result
        return attn_w, out
    return None, result


# ----------------------------- pure-JAX reference ----------------------------
def _rotate_half_ref(x):
    x1, x2 = jnp.split(x, 2, axis=-1)
    return jnp.concatenate([-x2, x1], axis=-1)


def _apply_rope_ref(q, k, cos, sin):
    cos = cos[:, None, :, :]
    sin = sin[:, None, :, :]
    return q * cos + _rotate_half_ref(q) * sin, k * cos + _rotate_half_ref(k) * sin


def reference_forward(hidden_states, params, position_ids, attention_mask):
    B, S, H = hidden_states.shape
    x2d = hidden_states.reshape(B * S, H)
    q = (x2d @ params["wq"].T).reshape(B, S, NUM_HEADS, HEAD_DIM).transpose(0, 2, 1, 3)
    k = (x2d @ params["wk"].T).reshape(B, S, NUM_KV_HEADS, HEAD_DIM).transpose(0, 2, 1, 3)
    v = (x2d @ params["wv"].T).reshape(B, S, NUM_KV_HEADS, HEAD_DIM).transpose(0, 2, 1, 3)
    cos, sin = rope_cos_sin(position_ids, HEAD_DIM, ROPE_THETA)
    q, k = _apply_rope_ref(q, k, cos, sin)
    k = jnp.repeat(k, N_REP, axis=1)
    v = jnp.repeat(v, N_REP, axis=1)
    scores = jnp.einsum("bhqd,bhkd->bhqk", q, k) / math.sqrt(HEAD_DIM)
    scores = scores + attention_mask
    w = jax.nn.softmax(scores.astype(jnp.float32), axis=-1)
    o = jnp.einsum("bhqk,bhkd->bhqd", w, v)
    o = o.transpose(0, 2, 1, 3).reshape(B * S, HIDDEN)
    o = (o @ params["wo"].T).reshape(B, S, HIDDEN)
    return w, o


# ----------------------------- main ------------------------------------------
if __name__ == "__main__":
    key = jax.random.PRNGKey(0)
    k_x, k_q, k_k, k_v, k_o = jax.random.split(key, 5)

    hidden_states = jax.random.normal(k_x, (BATCH, SEQ, HIDDEN), dtype=jnp.float32)
    position_ids = jnp.broadcast_to(jnp.arange(SEQ, dtype=jnp.int32), (BATCH, SEQ))

    scale = 1.0 / math.sqrt(HIDDEN)
    params = {
        # nn.Linear weight layout: (out_features, in_features); bias=False
        "wq": jax.random.normal(k_q, (NUM_HEADS * HEAD_DIM, HIDDEN), jnp.float32) * scale,
        "wk": jax.random.normal(k_k, (NUM_KV_HEADS * HEAD_DIM, HIDDEN), jnp.float32) * scale,
        "wv": jax.random.normal(k_v, (NUM_KV_HEADS * HEAD_DIM, HIDDEN), jnp.float32) * scale,
        "wo": jax.random.normal(k_o, (HIDDEN, HIDDEN), jnp.float32) * scale,
    }

    # Fused kernel (attention_output=True -> also returns the softmax weights).
    attn_w, attn_out = llama_gqa_forward(hidden_states, params, position_ids,
                                         output_attention=True)
    attn_w = jax.block_until_ready(attn_w)
    attn_out = jax.block_until_ready(attn_out)

    # Reference uses the explicit HF-style additive causal mask (same values the
    # kernel generates internally with iota).
    causal = jnp.tril(jnp.ones((SEQ, SEQ), dtype=bool))
    attention_mask = jnp.where(causal, 0.0, NEG_INF).astype(jnp.float32)
    attention_mask = jnp.broadcast_to(attention_mask, (BATCH, 1, SEQ, SEQ))

    ref_w, ref_out = reference_forward(hidden_states, params, position_ids, attention_mask)
    assert jnp.allclose(attn_w, ref_w, atol=2e-5, rtol=2e-5), "attention weights mismatch"
    assert jnp.allclose(attn_out, ref_out, atol=1e-4, rtol=1e-4), "attention output mismatch"

    print("KERNEL_OK")
</pallas_src>

<mosaic_0001>
module attributes {stable_mosaic.version = 11 : i64} {
  func.func @_fused_gqa_kernel(%arg0: memref<16x32xf32, #tpu.memory_space<vmem>>, %arg1: memref<32x112xf32, #tpu.memory_space<vmem>>, %arg2: memref<32x32xf32, #tpu.memory_space<vmem>>, %arg3: memref<16x32xf32, #tpu.memory_space<vmem>>, %arg4: memref<16x32xf32, #tpu.memory_space<vmem>>, %arg5: memref<16x16xf32, #tpu.memory_space<vmem>>, %arg6: memref<16x16xf32, #tpu.memory_space<vmem>>, %arg7: memref<2x4x8x8xf32, #tpu.memory_space<vmem>>, %arg8: memref<2x8x32xf32, #tpu.memory_space<vmem>>) attributes {dimension_semantics = [], scalar_prefetch = 0 : i64, scratch_operands = 0 : i64, tpu.core_type = #tpu.core_type<tc>} {
    %c0 = arith.constant 0 : index
    %c0_0 = arith.constant 0 : index
    %0 = vector.load %arg0[%c0, %c0_0] : memref<16x32xf32, #tpu.memory_space<vmem>>, vector<16x32xf32>
    %c0_1 = arith.constant 0 : index
    %c0_2 = arith.constant 0 : index
    %1 = vector.load %arg1[%c0_1, %c0_2] : memref<32x112xf32, #tpu.memory_space<vmem>>, vector<32x112xf32>
    %cst = arith.constant dense<0.000000e+00> : vector<16x112xf32>
    %2 = tpu.matmul %0, %1, %cst {dimension_numbers = #tpu.dot_dimension_numbers<[1], [0], [0], [1], [0, 0, 1, 1], [], []>} : vector<16x32xf32>, vector<32x112xf32>, vector<16x112xf32> -> vector<16x112xf32>
    %3 = vector.extract_strided_slice %2 {offsets = [0, 0], sizes = [16, 32], strides = [1, 1]} : vector<16x112xf32> to vector<16x32xf32>
    %4 = vector.extract_strided_slice %2 {offsets = [0, 32], sizes = [16, 16], strides = [1, 1]} : vector<16x112xf32> to vector<16x16xf32>
    %5 = vector.extract_strided_slice %2 {offsets = [0, 48], sizes = [16, 16], strides = [1, 1]} : vector<16x112xf32> to vector<16x16xf32>
    %6 = vector.extract_strided_slice %2 {offsets = [0, 64], sizes = [16, 32], strides = [1, 1]} : vector<16x112xf32> to vector<16x32xf32>
    %7 = vector.extract_strided_slice %2 {offsets = [0, 96], sizes = [16, 16], strides = [1, 1]} : vector<16x112xf32> to vector<16x16xf32>
    %c0_3 = arith.constant 0 : index
    %c0_4 = arith.constant 0 : index
    %8 = vector.load %arg3[%c0_3, %c0_4] : memref<16x32xf32, #tpu.memory_space<vmem>>, vector<16x32xf32>
    %9 = arith.mulf %3, %8 : vector<16x32xf32>
    %c0_5 = arith.constant 0 : index
    %c0_6 = arith.constant 0 : index
    %10 = vector.load %arg4[%c0_5, %c0_6] : memref<16x32xf32, #tpu.memory_space<vmem>>, vector<16x32xf32>
    %11 = arith.mulf %6, %10 : vector<16x32xf32>
    %12 = arith.addf %9, %11 : vector<16x32xf32>
    %c0_7 = arith.constant 0 : index
    %c0_8 = arith.constant 0 : index
    %13 = vector.load %arg5[%c0_7, %c0_8] : memref<16x16xf32, #tpu.memory_space<vmem>>, vector<16x16xf32>
    %14 = arith.mulf %4, %13 : vector<16x16xf32>
    %c0_9 = arith.constant 0 : index
    %c0_10 = arith.constant 0 : index
    %15 = vector.load %arg6[%c0_9, %c0_10] : memref<16x16xf32, #tpu.memory_space<vmem>>, vector<16x16xf32>
    %16 = arith.mulf %7, %15 : vector<16x16xf32>
    %17 = arith.addf %14, %16 : vector<16x16xf32>
    %c0_11 = arith.constant 0 : index
    %c0_12 = arith.constant 0 : index
    %18 = vector.load %arg2[%c0_11, %c0_12] : memref<32x32xf32, #tpu.memory_space<vmem>>, vector<32x32xf32>
    %19 = tpu.iota {dimensions = array<i32: 0>} : vector<8x8xi32>
    %20 = tpu.iota {dimensions = array<i32: 1>} : vector<8x8xi32>
    %21 = arith.cmpi sle, %20, %19 : vector<8x8xi32>
    %cst_13 = arith.constant 0.000000e+00 : f32
    %cst_14 = arith.constant -1.000000e+30 : f32
    %22 = vector.broadcast %cst_13 : f32 to vector<8x8xf32>
    %23 = vector.broadcast %cst_14 : f32 to vector<8x8xf32>
    %24 = arith.select %21, %22, %23 : vector<8x8xi1>, vector<8x8xf32>
    %cst_15 = arith.constant 0.000000e+00 : f32
    %25 = vector.broadcast %cst_15 : f32 to vector<8x32xf32>
    %26 = vector.extract_strided_slice %17 {offsets = [0, 0], sizes = [8, 8], strides = [1, 1]} : vector<16x16xf32> to vector<8x8xf32>
    %27 = vector.extract_strided_slice %5 {offsets = [0, 0], sizes = [8, 8], strides = [1, 1]} : vector<16x16xf32> to vector<8x8xf32>
    %28 = vector.extract_strided_slice %12 {offsets = [0, 0], sizes = [8, 8], strides = [1, 1]} : vector<16x32xf32> to vector<8x8xf32>
    %29 = tpu.transpose %26, [1, 0] : vector<8x8xf32> -> vector<8x8xf32>
    %cst_16 = arith.constant dense<0.000000e+00> : vector<8x8xf32>
    %30 = tpu.matmul %28, %29, %cst_16 {dimension_numbers = #tpu.dot_dimension_numbers<[1], [0], [0], [1], [0, 0, 1, 1], [], []>} : vector<8x8xf32>, vector<8x8xf32>, vector<8x8xf32> -> vector<8x8xf32>
    %31 = arith.addf %30, %24 : vector<8x8xf32>
    %cst_17 = arith.constant dense<0xFF800000> : vector<8xf32>
    %32 = vector.multi_reduction <maximumf>, %31, %cst_17 [1] : vector<8x8xf32> to vector<8xf32>
    %33 = vector.shape_cast %32 : vector<8xf32> to vector<8x1xf32>
    %34 = vector.broadcast %33 : vector<8x1xf32> to vector<8x8xf32>
    %35 = arith.subf %31, %34 : vector<8x8xf32>
    %36 = math.exp %35 : vector<8x8xf32>
    %cst_18 = arith.constant dense<0.000000e+00> : vector<8xf32>
    %37 = vector.multi_reduction <add>, %36, %cst_18 [1] : vector<8x8xf32> to vector<8xf32>
    %38 = vector.shape_cast %37 : vector<8xf32> to vector<8x1xf32>
    %39 = tpu.reciprocal %38 : vector<8x1xf32> -> vector<8x1xf32>
    %40 = vector.broadcast %39 : vector<8x1xf32> to vector<8x8xf32>
    %41 = arith.mulf %36, %40 : vector<8x8xf32>
    %c0_19 = arith.constant 0 : index
    %c0_20 = arith.constant 0 : index
    %c0_21 = arith.constant 0 : index
    %c0_22 = arith.constant 0 : index
    %42 = vector.load %arg7[%c0_19, %c0_20, %c0_21, %c0_22] : memref<2x4x8x8xf32, #tpu.memory_space<vmem>>, vector<1x1x8x8xf32>
    %43 = vector.shape_cast %42 : vector<1x1x8x8xf32> to vector<8x8xf32>
    %44 = vector.shape_cast %41 : vector<8x8xf32> to vector<1x1x8x8xf32>
    tpu.vector_store %arg7[%c0_19, %c0_20, %c0_21, %c0_22], %44 {strides = array<i32>} : memref<2x4x8x8xf32, #tpu.memory_space<vmem>>, vector<1x1x8x8xf32>,
    %cst_23 = arith.constant dense<0.000000e+00> : vector<8x8xf32>
    %45 = tpu.matmul %41, %27, %cst_23 {dimension_numbers = #tpu.dot_dimension_numbers<[1], [0], [0], [1], [0, 0, 1, 1], [], []>} : vector<8x8xf32>, vector<8x8xf32>, vector<8x8xf32> -> vector<8x8xf32>
    %46 = vector.extract_strided_slice %18 {offsets = [0, 0], sizes = [8, 32], strides = [1, 1]} : vector<32x32xf32> to vector<8x32xf32>
    %cst_24 = arith.constant dense<0.000000e+00> : vector<8x32xf32>
    %47 = tpu.matmul %45, %46, %cst_24 {dimension_numbers = #tpu.dot_dimension_numbers<[1], [0], [0], [1], [0, 0, 1, 1], [], []>} : vector<8x8xf32>, vector<8x32xf32>, vector<8x32xf32> -> vector<8x32xf32>
    %48 = arith.addf %25, %47 : vector<8x32xf32>
    %49 = vector.extract_strided_slice %12 {offsets = [0, 8], sizes = [8, 8], strides = [1, 1]} : vector<16x32xf32> to vector<8x8xf32>
    %50 = tpu.transpose %26, [1, 0] : vector<8x8xf32> -> vector<8x8xf32>
    %cst_25 = arith.constant dense<0.000000e+00> : vector<8x8xf32>
    %51 = tpu.matmul %49, %50, %cst_25 {dimension_numbers = #tpu.dot_dimension_numbers<[1], [0], [0], [1], [0, 0, 1, 1], [], []>} : vector<8x8xf32>, vector<8x8xf32>, vector<8x8xf32> -> vector<8x8xf32>
    %52 = arith.addf %51, %24 : vector<8x8xf32>
    %cst_26 = arith.constant dense<0xFF800000> : vector<8xf32>
    %53 = vector.multi_reduction <maximumf>, %52, %cst_26 [1] : vector<8x8xf32> to vector<8xf32>
    %54 = vector.shape_cast %53 : vector<8xf32> to vector<8x1xf32>
    %55 = vector.broadcast %54 : vector<8x1xf32> to vector<8x8xf32>
    %56 = arith.subf %52, %55 : vector<8x8xf32>
    %57 = math.exp %56 : vector<8x8xf32>
    %cst_27 = arith.constant dense<0.000000e+00> : vector<8xf32>
    %58 = vector.multi_reduction <add>, %57, %cst_27 [1] : vector<8x8xf32> to vector<8xf32>
    %59 = vector.shape_cast %58 : vector<8xf32> to vector<8x1xf32>
    %60 = tpu.reciprocal %59 : vector<8x1xf32> -> vector<8x1xf32>
    %61 = vector.broadcast %60 : vector<8x1xf32> to vector<8x8xf32>
    %62 = arith.mulf %57, %61 : vector<8x8xf32>
    %c0_28 = arith.constant 0 : index
    %c1 = arith.constant 1 : index
    %c0_29 = arith.constant 0 : index
    %c0_30 = arith.constant 0 : index
    %63 = vector.load %arg7[%c0_28, %c1, %c0_29, %c0_30] : memref<2x4x8x8xf32, #tpu.memory_space<vmem>>, vector<1x1x8x8xf32>
    %64 = vector.shape_cast %63 : vector<1x1x8x8xf32> to vector<8x8xf32>
    %65 = vector.shape_cast %62 : vector<8x8xf32> to vector<1x1x8x8xf32>
    tpu.vector_store %arg7[%c0_28, %c1, %c0_29, %c0_30], %65 {strides = array<i32>} : memref<2x4x8x8xf32, #tpu.memory_space<vmem>>, vector<1x1x8x8xf32>,
    %cst_31 = arith.constant dense<0.000000e+00> : vector<8x8xf32>
    %66 = tpu.matmul %62, %27, %cst_31 {dimension_numbers = #tpu.dot_dimension_numbers<[1], [0], [0], [1], [0, 0, 1, 1], [], []>} : vector<8x8xf32>, vector<8x8xf32>, vector<8x8xf32> -> vector<8x8xf32>
    %67 = vector.extract_strided_slice %18 {offsets = [8, 0], sizes = [8, 32], strides = [1, 1]} : vector<32x32xf32> to vector<8x32xf32>
    %cst_32 = arith.constant dense<0.000000e+00> : vector<8x32xf32>
    %68 = tpu.matmul %66, %67, %cst_32 {dimension_numbers = #tpu.dot_dimension_numbers<[1], [0], [0], [1], [0, 0, 1, 1], [], []>} : vector<8x8xf32>, vector<8x32xf32>, vector<8x32xf32> -> vector<8x32xf32>
    %69 = arith.addf %48, %68 : vector<8x32xf32>
    %70 = vector.extract_strided_slice %17 {offsets = [0, 8], sizes = [8, 8], strides = [1, 1]} : vector<16x16xf32> to vector<8x8xf32>
    %71 = vector.extract_strided_slice %5 {offsets = [0, 8], sizes = [8, 8], strides = [1, 1]} : vector<16x16xf32> to vector<8x8xf32>
    %72 = vector.extract_strided_slice %12 {offsets = [0, 16], sizes = [8, 8], strides = [1, 1]} : vector<16x32xf32> to vector<8x8xf32>
    %73 = tpu.transpose %70, [1, 0] : vector<8x8xf32> -> vector<8x8xf32>
    %cst_33 = arith.constant dense<0.000000e+00> : vector<8x8xf32>
    %74 = tpu.matmul %72, %73, %cst_33 {dimension_numbers = #tpu.dot_dimension_numbers<[1], [0], [0], [1], [0, 0, 1, 1], [], []>} : vector<8x8xf32>, vector<8x8xf32>, vector<8x8xf32> -> vector<8x8xf32>
    %75 = arith.addf %74, %24 : vector<8x8xf32>
    %cst_34 = arith.constant dense<0xFF800000> : vector<8xf32>
    %76 = vector.multi_reduction <maximumf>, %75, %cst_34 [1] : vector<8x8xf32> to vector<8xf32>
    %77 = vector.shape_cast %76 : vector<8xf32> to vector<8x1xf32>
    %78 = vector.broadcast %77 : vector<8x1xf32> to vector<8x8xf32>
    %79 = arith.subf %75, %78 : vector<8x8xf32>
    %80 = math.exp %79 : vector<8x8xf32>
    %cst_35 = arith.constant dense<0.000000e+00> : vector<8xf32>
    %81 = vector.multi_reduction <add>, %80, %cst_35 [1] : vector<8x8xf32> to vector<8xf32>
    %82 = vector.shape_cast %81 : vector<8xf32> to vector<8x1xf32>
    %83 = tpu.reciprocal %82 : vector<8x1xf32> -> vector<8x1xf32>
    %84 = vector.broadcast %83 : vector<8x1xf32> to vector<8x8xf32>
    %85 = arith.mulf %80, %84 : vector<8x8xf32>
    %c0_36 = arith.constant 0 : index
    %c2 = arith.constant 2 : index
    %c0_37 = arith.constant 0 : index
    %c0_38 = arith.constant 0 : index
    %86 = vector.load %arg7[%c0_36, %c2, %c0_37, %c0_38] : memref<2x4x8x8xf32, #tpu.memory_space<vmem>>, vector<1x1x8x8xf32>
    %87 = vector.shape_cast %86 : vector<1x1x8x8xf32> to vector<8x8xf32>
    %88 = vector.shape_cast %85 : vector<8x8xf32> to vector<1x1x8x8xf32>
    tpu.vector_store %arg7[%c0_36, %c2, %c0_37, %c0_38], %88 {strides = array<i32>} : memref<2x4x8x8xf32, #tpu.memory_space<vmem>>, vector<1x1x8x8xf32>,
    %cst_39 = arith.constant dense<0.000000e+00> : vector<8x8xf32>
    %89 = tpu.matmul %85, %71, %cst_39 {dimension_numbers = #tpu.dot_dimension_numbers<[1], [0], [0], [1], [0, 0, 1, 1], [], []>} : vector<8x8xf32>, vector<8x8xf32>, vector<8x8xf32> -> vector<8x8xf32>
    %90 = vector.extract_strided_slice %18 {offsets = [16, 0], sizes = [8, 32], strides = [1, 1]} : vector<32x32xf32> to vector<8x32xf32>
    %cst_40 = arith.constant dense<0.000000e+00> : vector<8x32xf32>
    %91 = tpu.matmul %89, %90, %cst_40 {dimension_numbers = #tpu.dot_dimension_numbers<[1], [0], [0], [1], [0, 0, 1, 1], [], []>} : vector<8x8xf32>, vector<8x32xf32>, vector<8x32xf32> -> vector<8x32xf32>
    %92 = arith.addf %69, %91 : vector<8x32xf32>
    %93 = vector.extract_strided_slice %12 {offsets = [0, 24], sizes = [8, 8], strides = [1, 1]} : vector<16x32xf32> to vector<8x8xf32>
    %94 = tpu.transpose %70, [1, 0] : vector<8x8xf32> -> vector<8x8xf32>
    %cst_41 = arith.constant dense<0.000000e+00> : vector<8x8xf32>
    %95 = tpu.matmul %93, %94, %cst_41 {dimension_numbers = #tpu.dot_dimension_numbers<[1], [0], [0], [1], [0, 0, 1, 1], [], []>} : vector<8x8xf32>, vector<8x8xf32>, vector<8x8xf32> -> vector<8x8xf32>
    %96 = arith.addf %95, %24 : vector<8x8xf32>
    %cst_42 = arith.constant dense<0xFF800000> : vector<8xf32>
    %97 = vector.multi_reduction <maximumf>, %96, %cst_42 [1] : vector<8x8xf32> to vector<8xf32>
    %98 = vector.shape_cast %97 : vector<8xf32> to vector<8x1xf32>
    %99 = vector.broadcast %98 : vector<8x1xf32> to vector<8x8xf32>
    %100 = arith.subf %96, %99 : vector<8x8xf32>
    %101 = math.exp %100 : vector<8x8xf32>
    %cst_43 = arith.constant dense<0.000000e+00> : vector<8xf32>
    %102 = vector.multi_reduction <add>, %101, %cst_43 [1] : vector<8x8xf32> to vector<8xf32>
    %103 = vector.shape_cast %102 : vector<8xf32> to vector<8x1xf32>
    %104 = tpu.reciprocal %103 : vector<8x1xf32> -> vector<8x1xf32>
    %105 = vector.broadcast %104 : vector<8x1xf32> to vector<8x8xf32>
    %106 = arith.mulf %101, %105 : vector<8x8xf32>
    %c0_44 = arith.constant 0 : index
    %c3 = arith.constant 3 : index
    %c0_45 = arith.constant 0 : index
    %c0_46 = arith.constant 0 : index
    %107 = vector.load %arg7[%c0_44, %c3, %c0_45, %c0_46] : memref<2x4x8x8xf32, #tpu.memory_space<vmem>>, vector<1x1x8x8xf32>
    %108 = vector.shape_cast %107 : vector<1x1x8x8xf32> to vector<8x8xf32>
    %109 = vector.shape_cast %106 : vector<8x8xf32> to vector<1x1x8x8xf32>
    tpu.vector_store %arg7[%c0_44, %c3, %c0_45, %c0_46], %109 {strides = array<i32>} : memref<2x4x8x8xf32, #tpu.memory_space<vmem>>, vector<1x1x8x8xf32>,
    %cst_47 = arith.constant dense<0.000000e+00> : vector<8x8xf32>
    %110 = tpu.matmul %106, %71, %cst_47 {dimension_numbers = #tpu.dot_dimension_numbers<[1], [0], [0], [1], [0, 0, 1, 1], [], []>} : vector<8x8xf32>, vector<8x8xf32>, vector<8x8xf32> -> vector<8x8xf32>
    %111 = vector.extract_strided_slice %18 {offsets = [24, 0], sizes = [8, 32], strides = [1, 1]} : vector<32x32xf32> to vector<8x32xf32>
    %cst_48 = arith.constant dense<0.000000e+00> : vector<8x32xf32>
    %112 = tpu.matmul %110, %111, %cst_48 {dimension_numbers = #tpu.dot_dimension_numbers<[1], [0], [0], [1], [0, 0, 1, 1], [], []>} : vector<8x8xf32>, vector<8x32xf32>, vector<8x32xf32> -> vector<8x32xf32>
    %113 = arith.addf %92, %112 : vector<8x32xf32>
    %c0_49 = arith.constant 0 : index
    %c0_50 = arith.constant 0 : index
    %c0_51 = arith.constant 0 : index
    %114 = vector.load %arg8[%c0_49, %c0_50, %c0_51] : memref<2x8x32xf32, #tpu.memory_space<vmem>>, vector<1x8x32xf32>
    %115 = vector.shape_cast %114 : vector<1x8x32xf32> to vector<8x32xf32>
    %116 = vector.shape_cast %113 : vector<8x32xf32> to vector<1x8x32xf32>
    tpu.vector_store %arg8[%c0_49, %c0_50, %c0_51], %116 {strides = array<i32>} : memref<2x8x32xf32, #tpu.memory_space<vmem>>, vector<1x8x32xf32>,
    %cst_52 = arith.constant 0.000000e+00 : f32
    %117 = vector.broadcast %cst_52 : f32 to vector<8x32xf32>
    %118 = vector.extract_strided_slice %17 {offsets = [8, 0], sizes = [8, 8], strides = [1, 1]} : vector<16x16xf32> to vector<8x8xf32>
    %119 = vector.extract_strided_slice %5 {offsets = [8, 0], sizes = [8, 8], strides = [1, 1]} : vector<16x16xf32> to vector<8x8xf32>
    %120 = vector.extract_strided_slice %12 {offsets = [8, 0], sizes = [8, 8], strides = [1, 1]} : vector<16x32xf32> to vector<8x8xf32>
    %121 = tpu.transpose %118, [1, 0] : vector<8x8xf32> -> vector<8x8xf32>
    %cst_53 = arith.constant dense<0.000000e+00> : vector<8x8xf32>
    %122 = tpu.matmul %120, %121, %cst_53 {dimension_numbers = #tpu.dot_dimension_numbers<[1], [0], [0], [1], [0, 0, 1, 1], [], []>} : vector<8x8xf32>, vector<8x8xf32>, vector<8x8xf32> -> vector<8x8xf32>
    %123 = arith.addf %122, %24 : vector<8x8xf32>
    %cst_54 = arith.constant dense<0xFF800000> : vector<8xf32>
    %124 = vector.multi_reduction <maximumf>, %123, %cst_54 [1] : vector<8x8xf32> to vector<8xf32>
    %125 = vector.shape_cast %124 : vector<8xf32> to vector<8x1xf32>
    %126 = vector.broadcast %125 : vector<8x1xf32> to vector<8x8xf32>
    %127 = arith.subf %123, %126 : vector<8x8xf32>
    %128 = math.exp %127 : vector<8x8xf32>
    %cst_55 = arith.constant dense<0.000000e+00> : vector<8xf32>
    %129 = vector.multi_reduction <add>, %128, %cst_55 [1] : vector<8x8xf32> to vector<8xf32>
    %130 = vector.shape_cast %129 : vector<8xf32> to vector<8x1xf32>
    %131 = tpu.reciprocal %130 : vector<8x1xf32> -> vector<8x1xf32>
    %132 = vector.broadcast %131 : vector<8x1xf32> to vector<8x8xf32>
    %133 = arith.mulf %128, %132 : vector<8x8xf32>
    %c1_56 = arith.constant 1 : index
    %c0_57 = arith.constant 0 : index
    %c0_58 = arith.constant 0 : index
    %c0_59 = arith.constant 0 : index
    %134 = vector.load %arg7[%c1_56, %c0_57, %c0_58, %c0_59] : memref<2x4x8x8xf32, #tpu.memory_space<vmem>>, vector<1x1x8x8xf32>
    %135 = vector.shape_cast %134 : vector<1x1x8x8xf32> to vector<8x8xf32>
    %136 = vector.shape_cast %133 : vector<8x8xf32> to vector<1x1x8x8xf32>
    tpu.vector_store %arg7[%c1_56, %c0_57, %c0_58, %c0_59], %136 {strides = array<i32>} : memref<2x4x8x8xf32, #tpu.memory_space<vmem>>, vector<1x1x8x8xf32>,
    %cst_60 = arith.constant dense<0.000000e+00> : vector<8x8xf32>
    %137 = tpu.matmul %133, %119, %cst_60 {dimension_numbers = #tpu.dot_dimension_numbers<[1], [0], [0], [1], [0, 0, 1, 1], [], []>} : vector<8x8xf32>, vector<8x8xf32>, vector<8x8xf32> -> vector<8x8xf32>
    %138 = vector.extract_strided_slice %18 {offsets = [0, 0], sizes = [8, 32], strides = [1, 1]} : vector<32x32xf32> to vector<8x32xf32>
    %cst_61 = arith.constant dense<0.000000e+00> : vector<8x32xf32>
    %139 = tpu.matmul %137, %138, %cst_61 {dimension_numbers = #tpu.dot_dimension_numbers<[1], [0], [0], [1], [0, 0, 1, 1], [], []>} : vector<8x8xf32>, vector<8x32xf32>, vector<8x32xf32> -> vector<8x32xf32>
    %140 = arith.addf %117, %139 : vector<8x32xf32>
    %141 = vector.extract_strided_slice %12 {offsets = [8, 8], sizes = [8, 8], strides = [1, 1]} : vector<16x32xf32> to vector<8x8xf32>
    %142 = tpu.transpose %118, [1, 0] : vector<8x8xf32> -> vector<8x8xf32>
    %cst_62 = arith.constant dense<0.000000e+00> : vector<8x8xf32>
    %143 = tpu.matmul %141, %142, %cst_62 {dimension_numbers = #tpu.dot_dimension_numbers<[1], [0], [0], [1], [0, 0, 1, 1], [], []>} : vector<8x8xf32>, vector<8x8xf32>, vector<8x8xf32> -> vector<8x8xf32>
    %144 = arith.addf %143, %24 : vector<8x8xf32>
    %cst_63 = arith.constant dense<0xFF800000> : vector<8xf32>
    %145 = vector.multi_reduction <maximumf>, %144, %cst_63 [1] : vector<8x8xf32> to vector<8xf32>
    %146 = vector.shape_cast %145 : vector<8xf32> to vector<8x1xf32>
    %147 = vector.broadcast %146 : vector<8x1xf32> to vector<8x8xf32>
    %148 = arith.subf %144, %147 : vector<8x8xf32>
    %149 = math.exp %148 : vector<8x8xf32>
    %cst_64 = arith.constant dense<0.000000e+00> : vector<8xf32>
    %150 = vector.multi_reduction <add>, %149, %cst_64 [1] : vector<8x8xf32> to vector<8xf32>
    %151 = vector.shape_cast %150 : vector<8xf32> to vector<8x1xf32>
    %152 = tpu.reciprocal %151 : vector<8x1xf32> -> vector<8x1xf32>
    %153 = vector.broadcast %152 : vector<8x1xf32> to vector<8x8xf32>
    %154 = arith.mulf %149, %153 : vector<8x8xf32>
    %c1_65 = arith.constant 1 : index
    %c1_66 = arith.constant 1 : index
    %c0_67 = arith.constant 0 : index
    %c0_68 = arith.constant 0 : index
    %155 = vector.load %arg7[%c1_65, %c1_66, %c0_67, %c0_68] : memref<2x4x8x8xf32, #tpu.memory_space<vmem>>, vector<1x1x8x8xf32>
    %156 = vector.shape_cast %155 : vector<1x1x8x8xf32> to vector<8x8xf32>
    %157 = vector.shape_cast %154 : vector<8x8xf32> to vector<1x1x8x8xf32>
    tpu.vector_store %arg7[%c1_65, %c1_66, %c0_67, %c0_68], %157 {strides = array<i32>} : memref<2x4x8x8xf32, #tpu.memory_space<vmem>>, vector<1x1x8x8xf32>,
    %cst_69 = arith.constant dense<0.000000e+00> : vector<8x8xf32>
    %158 = tpu.matmul %154, %119, %cst_69 {dimension_numbers = #tpu.dot_dimension_numbers<[1], [0], [0], [1], [0, 0, 1, 1], [], []>} : vector<8x8xf32>, vector<8x8xf32>, vector<8x8xf32> -> vector<8x8xf32>
    %159 = vector.extract_strided_slice %18 {offsets = [8, 0], sizes = [8, 32], strides = [1, 1]} : vector<32x32xf32> to vector<8x32xf32>
    %cst_70 = arith.constant dense<0.000000e+00> : vector<8x32xf32>
    %160 = tpu.matmul %158, %159, %cst_70 {dimension_numbers = #tpu.dot_dimension_numbers<[1], [0], [0], [1], [0, 0, 1, 1], [], []>} : vector<8x8xf32>, vector<8x32xf32>, vector<8x32xf32> -> vector<8x32xf32>
    %161 = arith.addf %140, %160 : vector<8x32xf32>
    %162 = vector.extract_strided_slice %17 {offsets = [8, 8], sizes = [8, 8], strides = [1, 1]} : vector<16x16xf32> to vector<8x8xf32>
    %163 = vector.extract_strided_slice %5 {offsets = [8, 8], sizes = [8, 8], strides = [1, 1]} : vector<16x16xf32> to vector<8x8xf32>
    %164 = vector.extract_strided_slice %12 {offsets = [8, 16], sizes = [8, 8], strides = [1, 1]} : vector<16x32xf32> to vector<8x8xf32>
    %165 = tpu.transpose %162, [1, 0] : vector<8x8xf32> -> vector<8x8xf32>
    %cst_71 = arith.constant dense<0.000000e+00> : vector<8x8xf32>
    %166 = tpu.matmul %164, %165, %cst_71 {dimension_numbers = #tpu.dot_dimension_numbers<[1], [0], [0], [1], [0, 0, 1, 1], [], []>} : vector<8x8xf32>, vector<8x8xf32>, vector<8x8xf32> -> vector<8x8xf32>
    %167 = arith.addf %166, %24 : vector<8x8xf32>
    %cst_72 = arith.constant dense<0xFF800000> : vector<8xf32>
    %168 = vector.multi_reduction <maximumf>, %167, %cst_72 [1] : vector<8x8xf32> to vector<8xf32>
    %169 = vector.shape_cast %168 : vector<8xf32> to vector<8x1xf32>
    %170 = vector.broadcast %169 : vector<8x1xf32> to vector<8x8xf32>
    %171 = arith.subf %167, %170 : vector<8x8xf32>
    %172 = math.exp %171 : vector<8x8xf32>
    %cst_73 = arith.constant dense<0.000000e+00> : vector<8xf32>
    %173 = vector.multi_reduction <add>, %172, %cst_73 [1] : vector<8x8xf32> to vector<8xf32>
    %174 = vector.shape_cast %173 : vector<8xf32> to vector<8x1xf32>
    %175 = tpu.reciprocal %174 : vector<8x1xf32> -> vector<8x1xf32>
    %176 = vector.broadcast %175 : vector<8x1xf32> to vector<8x8xf32>
    %177 = arith.mulf %172, %176 : vector<8x8xf32>
    %c1_74 = arith.constant 1 : index
    %c2_75 = arith.constant 2 : index
    %c0_76 = arith.constant 0 : index
    %c0_77 = arith.constant 0 : index
    %178 = vector.load %arg7[%c1_74, %c2_75, %c0_76, %c0_77] : memref<2x4x8x8xf32, #tpu.memory_space<vmem>>, vector<1x1x8x8xf32>
    %179 = vector.shape_cast %178 : vector<1x1x8x8xf32> to vector<8x8xf32>
    %180 = vector.shape_cast %177 : vector<8x8xf32> to vector<1x1x8x8xf32>
    tpu.vector_store %arg7[%c1_74, %c2_75, %c0_76, %c0_77], %180 {strides = array<i32>} : memref<2x4x8x8xf32, #tpu.memory_space<vmem>>, vector<1x1x8x8xf32>,
    %cst_78 = arith.constant dense<0.000000e+00> : vector<8x8xf32>
    %181 = tpu.matmul %177, %163, %cst_78 {dimension_numbers = #tpu.dot_dimension_numbers<[1], [0], [0], [1], [0, 0, 1, 1], [], []>} : vector<8x8xf32>, vector<8x8xf32>, vector<8x8xf32> -> vector<8x8xf32>
    %182 = vector.extract_strided_slice %18 {offsets = [16, 0], sizes = [8, 32], strides = [1, 1]} : vector<32x32xf32> to vector<8x32xf32>
    %cst_79 = arith.constant dense<0.000000e+00> : vector<8x32xf32>
    %183 = tpu.matmul %181, %182, %cst_79 {dimension_numbers = #tpu.dot_dimension_numbers<[1], [0], [0], [1], [0, 0, 1, 1], [], []>} : vector<8x8xf32>, vector<8x32xf32>, vector<8x32xf32> -> vector<8x32xf32>
    %184 = arith.addf %161, %183 : vector<8x32xf32>
    %185 = vector.extract_strided_slice %12 {offsets = [8, 24], sizes = [8, 8], strides = [1, 1]} : vector<16x32xf32> to vector<8x8xf32>
    %186 = tpu.transpose %162, [1, 0] : vector<8x8xf32> -> vector<8x8xf32>
    %cst_80 = arith.constant dense<0.000000e+00> : vector<8x8xf32>
    %187 = tpu.matmul %185, %186, %cst_80 {dimension_numbers = #tpu.dot_dimension_numbers<[1], [0], [0], [1], [0, 0, 1, 1], [], []>} : vector<8x8xf32>, vector<8x8xf32>, vector<8x8xf32> -> vector<8x8xf32>
    %188 = arith.addf %187, %24 : vector<8x8xf32>
    %cst_81 = arith.constant dense<0xFF800000> : vector<8xf32>
    %189 = vector.multi_reduction <maximumf>, %188, %cst_81 [1] : vector<8x8xf32> to vector<8xf32>
    %190 = vector.shape_cast %189 : vector<8xf32> to vector<8x1xf32>
    %191 = vector.broadcast %190 : vector<8x1xf32> to vector<8x8xf32>
    %192 = arith.subf %188, %191 : vector<8x8xf32>
    %193 = math.exp %192 : vector<8x8xf32>
    %cst_82 = arith.constant dense<0.000000e+00> : vector<8xf32>
    %194 = vector.multi_reduction <add>, %193, %cst_82 [1] : vector<8x8xf32> to vector<8xf32>
    %195 = vector.shape_cast %194 : vector<8xf32> to vector<8x1xf32>
    %196 = tpu.reciprocal %195 : vector<8x1xf32> -> vector<8x1xf32>
    %197 = vector.broadcast %196 : vector<8x1xf32> to vector<8x8xf32>
    %198 = arith.mulf %193, %197 : vector<8x8xf32>
    %c1_83 = arith.constant 1 : index
    %c3_84 = arith.constant 3 : index
    %c0_85 = arith.constant 0 : index
    %c0_86 = arith.constant 0 : index
    %199 = vector.load %arg7[%c1_83, %c3_84, %c0_85, %c0_86] : memref<2x4x8x8xf32, #tpu.memory_space<vmem>>, vector<1x1x8x8xf32>
    %200 = vector.shape_cast %199 : vector<1x1x8x8xf32> to vector<8x8xf32>
    %201 = vector.shape_cast %198 : vector<8x8xf32> to vector<1x1x8x8xf32>
    tpu.vector_store %arg7[%c1_83, %c3_84, %c0_85, %c0_86], %201 {strides = array<i32>} : memref<2x4x8x8xf32, #tpu.memory_space<vmem>>, vector<1x1x8x8xf32>,
    %cst_87 = arith.constant dense<0.000000e+00> : vector<8x8xf32>
    %202 = tpu.matmul %198, %163, %cst_87 {dimension_numbers = #tpu.dot_dimension_numbers<[1], [0], [0], [1], [0, 0, 1, 1], [], []>} : vector<8x8xf32>, vector<8x8xf32>, vector<8x8xf32> -> vector<8x8xf32>
    %203 = vector.extract_strided_slice %18 {offsets = [24, 0], sizes = [8, 32], strides = [1, 1]} : vector<32x32xf32> to vector<8x32xf32>
    %cst_88 = arith.constant dense<0.000000e+00> : vector<8x32xf32>
    %204 = tpu.matmul %202, %203, %cst_88 {dimension_numbers = #tpu.dot_dimension_numbers<[1], [0], [0], [1], [0, 0, 1, 1], [], []>} : vector<8x8xf32>, vector<8x32xf32>, vector<8x32xf32> -> vector<8x32xf32>
    %205 = arith.addf %184, %204 : vector<8x32xf32>
    %c1_89 = arith.constant 1 : index
    %c0_90 = arith.constant 0 : index
    %c0_91 = arith.constant 0 : index
    %206 = vector.load %arg8[%c1_89, %c0_90, %c0_91] : memref<2x8x32xf32, #tpu.memory_space<vmem>>, vector<1x8x32xf32>
    %207 = vector.shape_cast %206 : vector<1x8x32xf32> to vector<8x32xf32>
    %208 = vector.shape_cast %205 : vector<8x32xf32> to vector<1x8x32xf32>
    tpu.vector_store %arg8[%c1_89, %c0_90, %c0_91], %208 {strides = array<i32>} : memref<2x8x32xf32, #tpu.memory_space<vmem>>, vector<1x8x32xf32>,
    return
  }
}

</mosaic_0001>

<bundles_post_ra>
// kernel: tpu_custom_call.1
= control target key start
LH: loop header
LB: loop body
LE: loop exit
PB: predicated region body
PF: predicated region fallthrough
CT: control target
= control target key end

     0   :  { %14 = vsyncpa [#allocation3], 0  ;;  %s3112_s0 = inlined_call_operand.hbm [shape: f32[16,32], index: 0, kind: input, shape index: {}]   ;;  %s3113_s1 = inlined_call_operand.hbm [shape: f32[32,112], index: 1, kind: input, shape index: {}]   ;;  %s3114_s2 = inlined_call_operand.hbm [shape: f32[32,32], index: 2, kind: input, shape index: {}]   ;;  %s3115_s3 = inlined_call_operand.hbm [shape: f32[16,32], index: 3, kind: input, shape index: {}]   ;;  %s3116_s4 = inlined_call_operand.hbm [shape: f32[16,32], index: 4, kind: input, shape index: {}]   ;;  %s3117_s5 = inlined_call_operand.vmem [shape: f32[16,16], index: 5, kind: input, shape index: {}]   ;;  %s3118_s6 = inlined_call_operand.hbm [shape: f32[16,16], index: 6, kind: input, shape index: {}]   ;;  %s3119_s7 = inlined_call_operand.hbm [shape: f32[2,4,8,8], index: 7, kind: output, shape index: {0}]   ;;  %s3120_s8 = inlined_call_operand.hbm [shape: f32[2,8,32], index: 8, kind: output, shape index: {1}]  }
   0x1   :  { %15 = vsyncpa [#allocation6], 0 }
   0x2   :  { %16 = vsyncpa [#allocation9], 0 }
   0x3   :  { %17 = vsyncpa [#allocation12], 0 }
   0x4   :  { %18 = vsyncpa [#allocation4], 0 }
   0x5   :  { %19 = vsyncpa [#allocation15], 0  ;;  %s2688_s27 = smov [#allocation5]   ;;  %s2689_s29 = smov [#allocation8]  }
   0x6   :  { %s37_s28 = sshll.u32 %s2688_s27, 4  ;;  %s61_s30 = sshll.u32 %s2689_s29, 4  ;;  %s38_s28 = int_to_ptr.vmem [resolvable:$true] %s37_s28  ;;  %s2755_s30 = int_to_ptr.vmem [resolvable:$true] %s61_s30 }
   0x7   :  { %s2500_s11 = scalar_lea.hbm %s3113_s1, 512 }
   0x8   :  { %p2501_p0 = scmp.ne.s32.totalorder %s3113_s1, %s2500_s11  ;;  %p2504_p1 = scmp.lt.u32.totalorder %s2500_s11, %s3113_s1 }
   0xa   :  { %p2506_p2 = pnand %p2504_p1, %p2501_p0 }
   0xc   :  { %2509 = shalt.err (!%p2506_p2)
}
   0xd   :  { %s2510_s16 = scalar_lea.vmem %s38_s28, 512  ;;  %p2515_p4 = scmp.lt.s32.totalorder %s38_s28, %s38_s28 }
   0xe   :  { %p2511_p3 = scmp.ne.s32.totalorder %s38_s28, %s2510_s16  ;;  %p2516_p5 = scmp.lt.s32.totalorder %s2510_s16, %s2510_s16 }
  0x10   :  { %p2517_p6 = por %p2516_p5, %p2515_p4 }
  0x12   :  { %p2518_p7 = pnand %p2517_p6, %p2511_p3 }
  0x14   :  { %2521 = shalt.err (!%p2518_p7)
}
  0x15   :  { %s2690_s17 = smov 128   ;;  %s2691_s18 = smov 8  }
  0x16   :  { %43 = dma.hbm_to_vmem [thread:$0]  %s3113_s1, 512, %s38_s28, [#allocation6], %s2690_s17, %s2690_s17, %s2691_s18  }
  0x17   :  { %s2522_s23 = scalar_lea.hbm %s3115_s3, 256 }
  0x18   :  { %p2523_p8 = scmp.ne.s32.totalorder %s3115_s3, %s2522_s23  ;;  %p2526_p9 = scmp.lt.u32.totalorder %s2522_s23, %s3115_s3 }
  0x1a   :  { %p2528_p10 = pnand %p2526_p9, %p2523_p8 }
  0x1c   :  { %2531 = shalt.err (!%p2528_p10)
}
  0x1d   :  { %s2532_s29 = scalar_lea.vmem %s2755_s30, 256  ;;  %p2537_p12 = scmp.lt.s32.totalorder %s2755_s30, %s2755_s30 }
  0x1e   :  { %p2533_p11 = scmp.ne.s32.totalorder %s2755_s30, %s2532_s29  ;;  %p2538_p13 = scmp.lt.s32.totalorder %s2532_s29, %s2532_s29 }
  0x20   :  { %p2539_p0 = por %p2538_p13, %p2537_p12 }
  0x22   :  { %p2540_p1 = pnand %p2539_p0, %p2533_p11 }
  0x24   :  { %2543 = shalt.err (!%p2540_p1)
}
  0x25   :  { %67 = dma.hbm_to_vmem [thread:$0]  %s3115_s3, 256, %s2755_s30, [#allocation9], %s2690_s17, %s2690_s17, %s2691_s18  }
  0x26   :  { %s2692_s9 = smov [#allocation2]   ;;  %s2693_s11 = smov [#allocation7]  }
  0x27   :  { %s25_s10 = sshll.u32 %s2692_s9, 4  ;;  %s49_s12 = sshll.u32 %s2693_s11, 4  ;;  %s26_s10 = int_to_ptr.vmem [resolvable:$true] %s25_s10  ;;  %s2792_s12 = int_to_ptr.vmem [resolvable:$true] %s49_s12 }
  0x28   :  { %s2544_s15 = scalar_lea.hbm %s3112_s0, 256 }
  0x29   :  { %p2545_p2 = scmp.ne.s32.totalorder %s3112_s0, %s2544_s15  ;;  %p2548_p3 = scmp.lt.u32.totalorder %s2544_s15, %s3112_s0 }
  0x2b   :  { %p2550_p4 = pnand %p2548_p3, %p2545_p2 }
  0x2d   :  { %2553 = shalt.err (!%p2550_p4)
}
  0x2e   :  { %s2554_s3 = scalar_lea.vmem %s26_s10, 256  ;;  %p2559_p6 = scmp.lt.s32.totalorder %s26_s10, %s26_s10 }
  0x2f   :  { %p2555_p5 = scmp.ne.s32.totalorder %s26_s10, %s2554_s3  ;;  %p2560_p7 = scmp.lt.s32.totalorder %s2554_s3, %s2554_s3 }
  0x31   :  { %p2561_p8 = por %p2560_p7, %p2559_p6 }
  0x33   :  { %p2562_p9 = pnand %p2561_p8, %p2555_p5 }
  0x35   :  { %2565 = shalt.err (!%p2562_p9)
}
  0x36   :  { %31 = dma.hbm_to_vmem [thread:$0]  %s3112_s0, 256, %s26_s10, [#allocation3], %s2690_s17, %s2690_s17, %s2691_s18  }
  0x37   :  { %s2566_s25 = scalar_lea.hbm %s3114_s2, 512 }
  0x38   :  { %p2567_p10 = scmp.ne.s32.totalorder %s3114_s2, %s2566_s25  ;;  %p2570_p11 = scmp.lt.u32.totalorder %s2566_s25, %s3114_s2 }
  0x3a   :  { %p2572_p12 = pnand %p2570_p11, %p2567_p10 }
  0x3c   :  { %2575 = shalt.err (!%p2572_p12)
}
  0x3d   :  { %s2576_s28 = scalar_lea.vmem %s2792_s12, 512  ;;  %p2581_p0 = scmp.lt.s32.totalorder %s2792_s12, %s2792_s12 }
  0x3e   :  { %p2577_p13 = scmp.ne.s32.totalorder %s2792_s12, %s2576_s28  ;;  %p2582_p1 = scmp.lt.s32.totalorder %s2576_s28, %s2576_s28 }
  0x40   :  { %p2583_p2 = por %p2582_p1, %p2581_p0 }
  0x42   :  { %p2584_p3 = pnand %p2583_p2, %p2577_p13 }
  0x44   :  { %2587 = shalt.err (!%p2584_p3)
}
  0x45   :  { %55 = dma.hbm_to_vmem [thread:$0]  %s3114_s2, 512, %s2792_s12, [#allocation6], %s2690_s17, %s2690_s17, %s2691_s18  }
  0x46   :  { %s2694_s10 = smov [#allocation10]   ;;  %s2695_s13 = smov [#allocation11]  }
  0x47   :  { %s73_s11 = sshll.u32 %s2694_s10, 4  ;;  %s87_s14 = sshll.u32 %s2695_s13, 4  ;;  %s74_s11 = int_to_ptr.vmem [resolvable:$true] %s73_s11  ;;  %s2829_s14 = int_to_ptr.vmem [resolvable:$true] %s87_s14 }
  0x48   :  { %s2588_s19 = scalar_lea.hbm %s3116_s4, 256 }
  0x49   :  { %p2589_p4 = scmp.ne.s32.totalorder %s3116_s4, %s2588_s19  ;;  %p2592_p5 = scmp.lt.u32.totalorder %s2588_s19, %s3116_s4 }
  0x4b   :  { %p2594_p6 = pnand %p2592_p5, %p2589_p4 }
  0x4d   :  { %2597 = shalt.err (!%p2594_p6)
}
  0x4e   :  { %s2598_s2 = scalar_lea.vmem %s74_s11, 256  ;;  %p2603_p8 = scmp.lt.s32.totalorder %s74_s11, %s74_s11 }
  0x4f   :  { %p2599_p7 = scmp.ne.s32.totalorder %s74_s11, %s2598_s2  ;;  %p2604_p9 = scmp.lt.s32.totalorder %s2598_s2, %s2598_s2 }
  0x51   :  { %p2605_p10 = por %p2604_p9, %p2603_p8 }
  0x53   :  { %p2606_p11 = pnand %p2605_p10, %p2599_p7 }
  0x55   :  { %2609 = shalt.err (!%p2606_p11)
}
  0x56   :  { %79 = dma.hbm_to_vmem [thread:$0]  %s3116_s4, 256, %s74_s11, [#allocation9], %s2690_s17, %s2690_s17, %s2691_s18  }
  0x57   :  { %s2610_s25 = scalar_lea.hbm %s3118_s6, 256 }
  0x58   :  { %p2611_p12 = scmp.ne.s32.totalorder %s3118_s6, %s2610_s25  ;;  %p2614_p13 = scmp.lt.u32.totalorder %s2610_s25, %s3118_s6 }
  0x5a   :  { %p2616_p0 = pnand %p2614_p13, %p2611_p12 }
  0x5c   :  { %2619 = shalt.err (!%p2616_p0)
}
  0x5d   :  { %s2620_s28 = scalar_lea.vmem %s2829_s14, 256  ;;  %p2625_p2 = scmp.lt.s32.totalorder %s2829_s14, %s2829_s14 }
  0x5e   :  { %p2621_p1 = scmp.ne.s32.totalorder %s2829_s14, %s2620_s28  ;;  %p2626_p3 = scmp.lt.s32.totalorder %s2620_s28, %s2620_s28 }
  0x60   :  { %p2627_p4 = por %p2626_p3, %p2625_p2 }
  0x62   :  { %p2628_p5 = pnand %p2627_p4, %p2621_p1 }
  0x64   :  { %2631 = shalt.err (!%p2628_p5)
}
  0x65   :  { %93 = dma.hbm_to_vmem [thread:$0]  %s3118_s6, 256, %s2829_s14, [#allocation12], %s2690_s17, %s2690_s17, %s2691_s18  }
  0x66   :  { %2676 = dma.done.wait [#allocation3], 256  }
  0x67   :  { %2677 = vsyncadd [#allocation3], 4294967040 }
  0x68   :  { %2678 = dma.done.wait [#allocation6], 1024  }
  0x69   :  { %2679 = vsyncadd [#allocation6], 4294966272 }
  0x6a   :  { %2680 = dma.done.wait [#allocation9], 512  }
  0x6b   :  { %2681 = vsyncadd [#allocation9], 4294966784 }
  0x6c   :  { %2682 = dma.done.wait [#allocation12], 256  }
  0x6d   :  { %2683 = vsyncadd [#allocation12], 4294967040  ;;  %vm118_vm0 = vcmask 261120   ;;  %v114_v0 = vld [vmem:[#allocation5] sm:$0xff]  ;;  %v115_v1 = vld [vmem:[#allocation5 + $0x8] sm:$0xff]  ;;  %s2696_s6 = smov 96   ;;  %v264_v27 = vlaneseq }
  0x6e   :  { %v116_v2 = vld [vmem:[#allocation5 + $0x10] sm:$0xff]  ;;  %v2426_v3 = vpack.c.bf16 %v115_v1, %v114_v0  ;;  %v117_v4 = vld [vmem:[#allocation5 + $0x18] sm:$0xff]  ;;  %v238_v7 = vld [vmem:[#allocation11] sm:$0xff]  ;;  %s2697_s11 = smov 32   ;;  %v2698_v10 = vmov 0.0   ;;  %s2699_s13 = smov 64  }
  0x6f   :  { %v112_v5 = vld [vmem:[#allocation2] sm:$0xff]  ;;  %v2430_v6 = vpack.c.bf16 %v117_v4, %v116_v2  ;;  %242 = vrot.lane.b32.xlu0 %v238_v7, %s2696_s6  ;;  %v113_v9 = vld [vmem:[#allocation2 + $0x8] sm:$0xff]  ;;  %2306 = vmatprep.subr.mxu1 %v2698_v10  ;;  %vm2700_vm1 = vmmov 0   ;;  %vm273_vm2 = vcmask 64512   ;;  %v200_v23 = vld [vmem:[#allocation8] sm:$0xff]  ;;  %v265_v28 = vshrl.u32 %v264_v27, 7 }
  0x70   :  { %2303 = vmatprep.mubr.msk.f32.mxu0 %vm118_vm0, %v112_v5  ;;  %2427 = vmatprep.subr.bf16.mxu0 %v2426_v3  ;;  %v226_v8 = vld [vmem:[%s3117_s5] sm:$0xff]  ;;  %v267_v29 = vand.u32 127, %v264_v27  ;;  %v2701_v30 = vmov -1e+30   ;;  %s2702_s14 = smov 80   ;;  %s2703_s15 = smov 120  }
  0x71   :  { %2429 = vmatpush3.bf16.msra.mxu0 %v2426_v3  ;;  %v204_v15 = vld [vmem:[#allocation10] sm:$0xff]  ;;  %2308 = vmatprep.mubr.msk.f32.mxu1 %vm2700_vm1, %v2698_v10  ;;  %s2704_s16 = smov 88   ;;  %s2705_s19 = smov 112   ;;  %v2934_v62 = vld [vmem:[#allocation7 + $0x8] sm:$0xff]  ;;  %v2938_v63 = vld [vmem:[#allocation7] sm:$0xff] }
  0x72   :  { %2431 = vmatprep.subr.bf16.mxu0 %v2430_v6  ;;  %vm268_vm3 = vcmp.le.s32.totalorder %v267_v29, %v265_v28  ;;  %s2706_s20 = smov 72   ;;  %s2707_s21 = smov 104  }
  0x73   :  { %230 = vrot.lane.b32.xlu0 %v226_v8, %s2697_s11  ;;  %v2899_v31 = vsel %vm268_vm3, 0.0, %v2701_v30 }
  0x75   :  { %2433 = vmatpush3.bf16.msra.mxu0 %v2430_v6 }
  0x76   :  { %2326 = vmatprep.subr.mxu0 %v2698_v10 }
  0x78   :  { %2304 = vmatmul.mubr.msk.f32.vlgmr.msra.gmra.mrb[0].mxu0 %vm118_vm0, %v113_v9 }
  0x79   :  { %2328 = vmatprep.mubr.msk.f32.mxu0 %vm2700_vm1, %v2698_v10  ;;  %2327 = vmatpush3.msra.mxu0 %v2934_v62 }
  0x7a   :  { %2331 = vmatprep.subr.mxu0 %v2698_v10 }
  0xe1   :  { %v243_v12 = vpop.permute.xlu0 %242 }
  0xe5   :  { %v231_v16 = vpop.permute.xlu0 %230 }
 0x14b   :  { %v2875_v11 = vpop.f32.mrb[0].mxu0 }
 0x14c   :  { %v2877_v13 = vpop.f32.mrb[1].mxu0 }
 0x14d   :  { %v248_v14 = vmul.f32 %v243_v12, %v2877_v13  ;;  %v236_v17 = vmul.f32 %v231_v16, %v2877_v13  ;;  %v202_v24 = vmul.f32 %v200_v23, %v2877_v13 }
 0x14f   :  { %252 = vrot.lane.b32.xlu1 %v248_v14, %s2699_s13 }
 0x153   :  { %208 = vrot.lane.b32.xlu1 %v204_v15, %s2699_s13  ;;  %v2956_v15 = vld [vmem:[#allocation7 + $0x10] sm:$0xff] }
 0x1c1   :  { %v253_v18 = vpop.permute.xlu1 %252 }
 0x1c2   :  { %v258_v19 = vadd.f32 %v253_v18, %v236_v17 }
 0x1c4   :  { %271 = vrot.lane.b32.xlu0 %v258_v19, %s2696_s6 }
 0x1c5   :  { %v209_v20 = vpop.permute.xlu1 %208 }
 0x1c6   :  { %v214_v21 = vmul.f32 %v209_v20, %v2877_v13 }
 0x1c8   :  { %218 = vrot.lane.b32.xlu1 %v214_v21, %s2699_s13 }
 0x236   :  { %v272_v22 = vpop.permute.xlu0 %271 }
 0x237   :  { %2307 = vmatpush3.xpose.msk.msra.mxu1 %vm273_vm2, %v272_v22 }
 0x238   :  { %2311 = vmatprep.subr.mxu1 %v2698_v10 }
 0x23a   :  { %v219_v25 = vpop.permute.xlu1 %218 }
 0x23b   :  { %v2893_v26 = vadd.f32 %v219_v25, %v202_v24  ;;  %v239_v25 = vld [vmem:[#allocation11 + $0x8] sm:$0xff] }
 0x23d   :  { %2309 = vmatmul.mubr.msk.f32.vlgmr.msra.gmra.mrb[0].mxu1 %vm273_vm2, %v2893_v26 }
 0x23e   :  { %2313 = vmatprep.mubr.msk.f32.mxu1 %vm2700_vm1, %v2698_v10 }
 0x310   :  { %v345_v32 = vpop.f32.mrb[0].mxu1 }
 0x311   :  { %v346_v33 = vadd.f32 %v345_v32, %v2899_v31  ;;  %v2310_v34 = vpop.f32.mrb[1].mxu1 }
 0x313   :  { %v349_v35 = vsel %vm273_vm2, %v346_v33, -inf }
 0x314   :  { %350 = vmax.xlane.f32.xlu0 %v349_v35 }
 0x32a   :  { %362 = vrot.lane.b32.xlu0 %v2877_v13, %s2702_s14 }
 0x3a1   :  { %v351_v36 = vpop.xlane.xlu0 %350 }
 0x3a2   :  { %v352_v37 = vsub.f32 %v346_v33, %v351_v36  ;;  %v205_v33 = vld [vmem:[#allocation10 + $0x8] sm:$0xff] }
 0x3a4   :  { %v353_v38 = vmul.f32 1.442695, %v352_v37 }
 0x3a5   :  { %v363_v39 = vpop.permute.xlu0 %362 }
 0x3a6   :  { %2468 = vpow2.f32 %v353_v38  ;;  %2312 = vmatpush3.msra.mxu1 %v363_v39 }
 0x3a7   :  { %2316 = vmatprep.subr.mxu1 %v2698_v10 }
 0x3b0   :  { %v2469_v40 = vpop.eup %2468 }
 0x3b1   :  { %v355_v41 = vsel %vm273_vm2, %v2469_v40, 0.0 }
 0x3b2   :  { %356 = vadd.xlane.f32.xlu1 %v355_v41 }
 0x3c3   :  { %438 = vrot.lane.b32.xlu1 %v2893_v26, %s2703_s15 }
 0x43f   :  { %v357_v42 = vpop.xlane.xlu1 %356 }
 0x440   :  { %2470 = vrcp.f32 %v357_v42 }
 0x443   :  { %v439_v45 = vpop.permute.xlu1 %438 }
 0x44a   :  { %v2471_v43 = vpop.eup %2470 }
 0x44b   :  { %v359_v44 = vmul.f32 %v2471_v43, %v2469_v40 }
 0x44d   :  { %360 = vst.msk [vmem:[#allocation13] sm:$0xff] %vm273_vm2, %v359_v44  ;;  %2314 = vmatmul.mubr.msk.f32.vlgmr.msra.gmra.mrb[2].mxu1 %vm273_vm2, %v359_v44 }
 0x44e   :  { %2317 = vmatpush3.xpose.msk.msra.mxu1 %vm273_vm2, %v272_v22  ;;  %2318 = vmatprep.mubr.msk.f32.mxu1 %vm2700_vm1, %v2698_v10 }
 0x44f   :  { %2321 = vmatprep.subr.mxu1 %v2698_v10 }
 0x451   :  { %2319 = vmatmul.mubr.msk.f32.vlgmr.msra.gmra.mrb[4].mxu1 %vm273_vm2, %v439_v45  ;;  %v2988_v45 = vld [vmem:[#allocation7 + $0x18] sm:$0xff] }
 0x452   :  { %2322 = vmatpush3.msra.mxu1 %v363_v39  ;;  %2323 = vmatprep.mubr.msk.f32.mxu1 %vm2700_vm1, %v2698_v10 }
 0x453   :  { %2336 = vmatprep.subr.mxu1 %v2698_v10 }
 0x520   :  { %v434_v46 = vpop.f32.mrb[2].mxu1 }
 0x521   :  { %v2315_v47 = vpop.f32.mrb[3].mxu1 }
 0x524   :  { %v508_v48 = vpop.f32.mrb[4].mxu1 }
 0x525   :  { %v509_v49 = vadd.f32 %v508_v48, %v2899_v31  ;;  %v2320_v50 = vpop.f32.mrb[5].mxu1 }
 0x527   :  { %v512_v51 = vsel %vm273_vm2, %v509_v49, -inf }
 0x528   :  { %513 = vmax.xlane.f32.xlu0 %v512_v51 }
 0x53e   :  { %746 = vrot.lane.b32.xlu0 %v258_v19, %s2704_s16 }
 0x5b5   :  { %v514_v52 = vpop.xlane.xlu0 %513 }
 0x5b6   :  { %v515_v53 = vsub.f32 %v509_v49, %v514_v52 }
 0x5b8   :  { %v516_v54 = vmul.f32 1.442695, %v515_v53 }
 0x5b9   :  { %v747_v60 = vpop.permute.xlu0 %746 }
 0x5ba   :  { %2472 = vpow2.f32 %v516_v54 }
 0x5c4   :  { %v2473_v55 = vpop.eup %2472 }
 0x5c5   :  { %v518_v56 = vsel %vm273_vm2, %v2473_v55, 0.0 }
 0x5c6   :  { %519 = vadd.xlane.f32.xlu1 %v518_v56 }
 0x5d7   :  { %744 = vrot.lane.b32.xlu1 %v2893_v26, %s2705_s19 }
 0x653   :  { %v520_v57 = vpop.xlane.xlu1 %519 }
 0x654   :  { %2474 = vrcp.f32 %v520_v57 }
 0x657   :  { %v745_v61 = vpop.permute.xlu1 %744 }
 0x65e   :  { %v2475_v58 = vpop.eup %2474 }
 0x65f   :  { %v522_v59 = vmul.f32 %v2475_v58, %v2473_v55 }
 0x661   :  { %524 = vst.msk [vmem:[#allocation13 + $0x8] sm:$0xff] %vm273_vm2, %v522_v59  ;;  %2324 = vmatmul.mubr.msk.f32.vlgmr.msra.gmra.mrb[6].mxu1 %vm273_vm2, %v522_v59 }
 0x662   :  { %2337 = vmatpush3.xpose.msk.msra.mxu1 %vm273_vm2, %v747_v60  ;;  %2338 = vmatprep.mubr.msk.f32.mxu1 %vm2700_vm1, %v2698_v10 }
 0x663   :  { %2341 = vmatprep.subr.mxu1 %v2698_v10 }
 0x665   :  { %2339 = vmatmul.mubr.msk.f32.vlgmr.msra.gmra.mrb[8].mxu1 %vm273_vm2, %v745_v61 }
 0x666   :  { %2343 = vmatprep.mubr.msk.f32.mxu1 %vm2700_vm1, %v2698_v10 }
 0x734   :  { %v594_v0 = vpop.f32.mrb[6].mxu1 }
 0x735   :  { %v2325_v1 = vpop.f32.mrb[7].mxu1  ;;  %2329 = vmatmul.mubr.msk.f32.vlgmr.msra.gmra.mrb[2].mxu0 %vm273_vm2, %v594_v0 }
 0x736   :  { %2332 = vmatpush3.msra.mxu0 %v2938_v63  ;;  %2333 = vmatprep.mubr.msk.f32.mxu0 %vm2700_vm1, %v2698_v10 }
 0x737   :  { %2346 = vmatprep.subr.mxu0 %v2698_v10 }
 0x738   :  { %v818_v2 = vpop.f32.mrb[8].mxu1 }
 0x739   :  { %v819_v3 = vadd.f32 %v818_v2, %v2899_v31  ;;  %v2340_v4 = vpop.f32.mrb[9].mxu1 }
 0x73b   :  { %v822_v5 = vsel %vm273_vm2, %v819_v3, -inf }
 0x73c   :  { %823 = vmax.xlane.f32.xlu0 %v822_v5 }
 0x73d   :  { %2334 = vmatmul.mubr.msk.f32.vlgmr.msra.gmra.mrb[2].mxu0 %vm273_vm2, %v434_v46  ;;  %v201_v46 = vld [vmem:[#allocation8 + $0x8] sm:$0xff] }
 0x73e   :  { %2348 = vmatprep.mubr.msk.f32.mxu0 %vm2700_vm1, %v2698_v10  ;;  %2347 = vmatpush3.msra.mxu0 %v2956_v15  ;;  %v203_v47 = vmul.f32 %v2875_v11, %v201_v46 }
 0x73f   :  { %2356 = vmatprep.subr.mxu0 %v2698_v10 }
 0x752   :  { %835 = vrot.lane.b32.xlu0 %v2877_v13, %s2706_s20 }
 0x7c9   :  { %v824_v6 = vpop.xlane.xlu0 %823 }
 0x7ca   :  { %v825_v7 = vsub.f32 %v819_v3, %v824_v6 }
 0x7cc   :  { %v826_v8 = vmul.f32 1.442695, %v825_v7 }
 0x7cd   :  { %v836_v9 = vpop.permute.xlu0 %835 }
 0x7ce   :  { %2476 = vpow2.f32 %v826_v8  ;;  %2342 = vmatpush3.msra.mxu1 %v836_v9 }
 0x7cf   :  { %2351 = vmatprep.subr.mxu1 %v2698_v10 }
 0x7d8   :  { %v2477_v12 = vpop.eup %2476 }
 0x7d9   :  { %v828_v14 = vsel %vm273_vm2, %v2477_v12, 0.0 }
 0x7da   :  { %829 = vadd.xlane.f32.xlu1 %v828_v14 }
 0x7eb   :  { %985 = vrot.lane.b32.xlu1 %v2893_v26, %s2707_s21  ;;  %v227_v26 = vld [vmem:[%s3117_s5 + $0x8] sm:$0xff]  ;;  %s2708_s5 = smov [#allocation13]  }
 0x7ec   :  { %s2176_s2 = sshll.u32 %s2708_s5, 4  ;;  %s2177_s2 = int_to_ptr.vmem [resolvable:$true] %s2176_s2 }
 0x7ed   :  { %s2632_s12 = scalar_lea.vmem %s2177_s2, 1024  ;;  %p2637_p7 = scmp.lt.s32.totalorder %s2177_s2, %s2177_s2 }
 0x7ee   :  { %p2633_p6 = scmp.ne.s32.totalorder %s2177_s2, %s2632_s12  ;;  %p2638_p8 = scmp.lt.s32.totalorder %s2632_s12, %s2632_s12 }
 0x7f0   :  { %p2639_p9 = por %p2638_p8, %p2637_p7 }
 0x7f2   :  { %p2640_p10 = pnand %p2639_p9, %p2633_p6 }
 0x867   :  { %v830_v13 = vpop.xlane.xlu1 %829 }
 0x868   :  { %2478 = vrcp.f32 %v830_v13 }
 0x86b   :  { %v986_v18 = vpop.permute.xlu1 %985 }
 0x872   :  { %v2479_v16 = vpop.eup %2478 }
 0x873   :  { %v832_v17 = vmul.f32 %v2479_v16, %v2477_v12 }
 0x875   :  { %834 = vst.msk [vmem:[#allocation13 + $0x10] sm:$0xff] %vm273_vm2, %v832_v17  ;;  %2344 = vmatmul.mubr.msk.f32.vlgmr.msra.gmra.mrb[10].mxu1 %vm273_vm2, %v832_v17 }
 0x876   :  { %2352 = vmatpush3.xpose.msk.msra.mxu1 %vm273_vm2, %v747_v60  ;;  %2353 = vmatprep.mubr.msk.f32.mxu1 %vm2700_vm1, %v2698_v10 }
 0x877   :  { %2366 = vmatprep.subr.mxu1 %v2698_v10 }
 0x879   :  { %2354 = vmatmul.mubr.msk.f32.vlgmr.msra.gmra.mrb[12].mxu1 %vm273_vm2, %v986_v18 }
 0x87a   :  { %2368 = vmatprep.mubr.msk.f32.mxu1 %vm2700_vm1, %v2698_v10 }
 0x948   :  { %v907_v19 = vpop.f32.mrb[10].mxu1 }
 0x949   :  { %v2345_v20 = vpop.f32.mrb[11].mxu1  ;;  %2349 = vmatmul.mubr.msk.f32.vlgmr.msra.gmra.mrb[2].mxu0 %vm273_vm2, %v907_v19 }
 0x94a   :  { %2357 = vmatpush3.msra.mxu0 %v836_v9  ;;  %2358 = vmatprep.mubr.msk.f32.mxu0 %vm2700_vm1, %v2698_v10 }
 0x94b   :  { %2361 = vmatprep.subr.mxu0 %v2698_v10 }
 0x94c   :  { %v1055_v21 = vpop.f32.mrb[12].mxu1 }
 0x94d   :  { %v1056_v22 = vadd.f32 %v1055_v21, %v2899_v31  ;;  %v2355_v23 = vpop.f32.mrb[13].mxu1 }
 0x94f   :  { %v1059_v24 = vsel %vm273_vm2, %v1056_v22, -inf }
 0x950   :  { %1060 = vmax.xlane.f32.xlu0 %v1059_v24 }
 0x966   :  { %244 = vrot.lane.b32.xlu0 %v239_v25, %s2696_s6 }
 0x96a   :  { %232 = vrot.lane.b32.xlu0 %v227_v26, %s2697_s11 }
 0x9dd   :  { %v1061_v27 = vpop.xlane.xlu0 %1060 }
 0x9de   :  { %v1062_v28 = vsub.f32 %v1056_v22, %v1061_v27 }
 0x9e0   :  { %v1063_v29 = vmul.f32 1.442695, %v1062_v28 }
 0x9e1   :  { %v245_v34 = vpop.permute.xlu0 %244 }
 0x9e2   :  { %2480 = vpow2.f32 %v1063_v29  ;;  %v249_v35 = vmul.f32 %v2875_v11, %v245_v34 }
 0x9e5   :  { %v233_v37 = vpop.permute.xlu0 %232 }
 0x9e6   :  { %v237_v40 = vmul.f32 %v2875_v11, %v233_v37 }
 0x9ec   :  { %v2481_v30 = vpop.eup %2480 }
 0x9ed   :  { %v1065_v32 = vsel %vm273_vm2, %v2481_v30, 0.0 }
 0x9ee   :  { %1066 = vadd.xlane.f32.xlu1 %v1065_v32 }
 0x9ff   :  { %210 = vrot.lane.b32.xlu1 %v205_v33, %s2699_s13 }
 0xa03   :  { %254 = vrot.lane.b32.xlu1 %v249_v35, %s2699_s13 }
 0xa7b   :  { %v1067_v36 = vpop.xlane.xlu1 %1066 }
 0xa7c   :  { %2482 = vrcp.f32 %v1067_v36 }
 0xa7f   :  { %v211_v38 = vpop.permute.xlu1 %210 }
 0xa80   :  { %v215_v39 = vmul.f32 %v2875_v11, %v211_v38 }
 0xa82   :  { %220 = vrot.lane.b32.xlu0 %v215_v39, %s2699_s13 }
 0xa83   :  { %v255_v41 = vpop.permute.xlu1 %254 }
 0xa84   :  { %v259_v42 = vadd.f32 %v255_v41, %v237_v40 }
 0xa86   :  { %v2483_v43 = vpop.eup %2482  ;;  %1221 = vrot.lane.b32.xlu1 %v259_v42, %s2696_s6 }
 0xa87   :  { %v1069_v44 = vmul.f32 %v2483_v43, %v2481_v30 }
 0xa89   :  { %1071 = vst.msk [vmem:[#allocation13 + $0x18] sm:$0xff] %vm273_vm2, %v1069_v44  ;;  %2359 = vmatmul.mubr.msk.f32.vlgmr.msra.gmra.mrb[4].mxu0 %vm273_vm2, %v1069_v44 }
 0xa8a   :  { %2362 = vmatpush3.msra.mxu0 %v2988_v45  ;;  %2363 = vmatprep.mubr.msk.f32.mxu0 %vm2700_vm1, %v2698_v10 }
 0xa8b   :  { %2376 = vmatprep.subr.mxu0 %v2698_v10 }
 0xaf4   :  { %v221_v48 = vpop.permute.xlu0 %220 }
 0xaf5   :  { %v2997_v49 = vadd.f32 %v221_v48, %v203_v47 }
 0xaf7   :  { %1388 = vrot.lane.b32.xlu0 %v2997_v49, %s2703_s15 }
 0xaf8   :  { %v1222_v50 = vpop.permute.xlu1 %1221 }
 0xaf9   :  { %2367 = vmatpush3.xpose.msk.msra.mxu1 %vm273_vm2, %v1222_v50 }
 0xafa   :  { %2371 = vmatprep.subr.mxu1 %v2698_v10 }
 0xafc   :  { %2369 = vmatmul.mubr.msk.f32.vlgmr.msra.gmra.mrb[14].mxu1 %vm273_vm2, %v2997_v49 }
 0xafd   :  { %2373 = vmatprep.mubr.msk.f32.mxu1 %vm2700_vm1, %v2698_v10 }
 0xb5c   :  { %v1141_v51 = vpop.f32.mrb[4].mxu0 }
 0xb5d   :  { %v2360_v52 = vpop.f32.mrb[5].mxu0  ;;  %2364 = vmatmul.mubr.msk.f32.vlgmr.msra.gmra.mrb[2].mxu0 %vm273_vm2, %v1141_v51 }
 0xb5e   :  { %2377 = vmatpush3.xpose.msk.msra.mxu0 %vm273_vm2, %v1222_v50  ;;  %2378 = vmatprep.mubr.msk.f32.mxu0 %vm2700_vm1, %v2698_v10 }
 0xb5f   :  { %2386 = vmatprep.subr.mxu0 %v2698_v10 }
 0xb69   :  { %v1389_v53 = vpop.permute.xlu0 %1388 }
 0xb6a   :  { %2379 = vmatmul.mubr.msk.f32.vlgmr.msra.gmra.mrb[6].mxu0 %vm273_vm2, %v1389_v53 }
 0xb6b   :  { %2387 = vmatpush3.msra.mxu0 %v2934_v62  ;;  %2388 = vmatprep.mubr.msk.f32.mxu0 %vm2700_vm1, %v2698_v10 }
 0xb6c   :  { %2391 = vmatprep.subr.mxu0 %v2698_v10 }
 0xbcf   :  { %v1294_v54 = vpop.f32.mrb[14].mxu1 }
 0xbd0   :  { %v1295_v55 = vadd.f32 %v1294_v54, %v2899_v31  ;;  %v2370_v56 = vpop.f32.mrb[15].mxu1 }
 0xbd2   :  { %v1298_v57 = vsel %vm273_vm2, %v1295_v55, -inf }
 0xbd3   :  { %1299 = vmax.xlane.f32.xlu1 %v1298_v57 }
 0xbe4   :  { %1696 = vrot.lane.b32.xlu1 %v259_v42, %s2704_s16 }
 0xc30   :  { %v1214_v58 = vpop.f32.mrb[2].mxu0 }
 0xc31   :  { %1219 = vst.msk [vmem:[#allocation14] sm:$0xff] %vm118_vm0, %v1214_v58  ;;  %v2365_v59 = vpop.f32.mrb[3].mxu0 }
 0xc3d   :  { %v1458_v60 = vpop.f32.mrb[6].mxu0 }
 0xc3e   :  { %v1459_v61 = vadd.f32 %v1458_v60, %v2899_v31  ;;  %v2380_v62 = vpop.f32.mrb[7].mxu0 }
 0xc40   :  { %v1462_v0 = vsel %vm273_vm2, %v1459_v61, -inf }
 0xc41   :  { %1463 = vmax.xlane.f32.xlu0 %v1462_v0 }
 0xc60   :  { %v1300_v1 = vpop.xlane.xlu1 %1299 }
 0xc61   :  { %v1301_v2 = vsub.f32 %v1295_v55, %v1300_v1 }
 0xc63   :  { %v1302_v3 = vmul.f32 1.442695, %v1301_v2 }
 0xc64   :  { %v1697_v18 = vpop.permute.xlu1 %1696 }
 0xc65   :  { %2484 = vpow2.f32 %v1302_v3 }
 0xc6f   :  { %v2485_v4 = vpop.eup %2484 }
 0xc70   :  { %v1304_v5 = vsel %vm273_vm2, %v2485_v4, 0.0 }
 0xc71   :  { %1305 = vadd.xlane.f32.xlu0 %v1304_v5 }
 0xc87   :  { %1312 = vrot.lane.b32.xlu0 %v2875_v11, %s2702_s14 }
 0xcce   :  { %v1464_v6 = vpop.xlane.xlu0 %1463 }
 0xccf   :  { %v1465_v7 = vsub.f32 %v1459_v61, %v1464_v6 }
 0xcd1   :  { %v1466_v8 = vmul.f32 1.442695, %v1465_v7 }
 0xcd3   :  { %2486 = vpow2.f32 %v1466_v8 }
 0xcdd   :  { %v2487_v9 = vpop.eup %2486 }
 0xcde   :  { %v1468_v12 = vsel %vm273_vm2, %v2487_v9, 0.0 }
 0xcdf   :  { %1469 = vadd.xlane.f32.xlu1 %v1468_v12 }
 0xcf0   :  { %1694 = vrot.lane.b32.xlu1 %v2997_v49, %s2705_s19 }
 0xcfe   :  { %v1306_v14 = vpop.xlane.xlu0 %1305 }
 0xcff   :  { %2488 = vrcp.f32 %v1306_v14 }
 0xd02   :  { %v1313_v13 = vpop.permute.xlu0 %1312 }
 0xd03   :  { %2372 = vmatpush3.msra.mxu1 %v1313_v13 }
 0xd04   :  { %2381 = vmatprep.subr.mxu1 %v2698_v10 }
 0xd09   :  { %v2489_v16 = vpop.eup %2488 }
 0xd0a   :  { %v1308_v17 = vmul.f32 %v2489_v16, %v2485_v4 }
 0xd0c   :  { %1310 = vst.msk [vmem:[#allocation13 + $0x20] sm:$0xff] %vm273_vm2, %v1308_v17  ;;  %2374 = vmatmul.mubr.msk.f32.vlgmr.msra.gmra.mrb[16].mxu1 %vm273_vm2, %v1308_v17 }
 0xd0d   :  { %2382 = vmatpush3.msra.mxu1 %v1313_v13  ;;  %2383 = vmatprep.mubr.msk.f32.mxu1 %vm2700_vm1, %v2698_v10 }
 0xd0e   :  { %2396 = vmatprep.subr.mxu1 %v2698_v10 }
 0xd6c   :  { %v1470_v19 = vpop.xlane.xlu1 %1469 }
 0xd6d   :  { %2490 = vrcp.f32 %v1470_v19 }
 0xd70   :  { %v1695_v22 = vpop.permute.xlu1 %1694 }
 0xd77   :  { %v2491_v20 = vpop.eup %2490 }
 0xd78   :  { %v1472_v21 = vmul.f32 %v2491_v20, %v2487_v9 }
 0xd7a   :  { %1474 = vst.msk [vmem:[#allocation13 + $0x28] sm:$0xff] %vm273_vm2, %v1472_v21  ;;  %2384 = vmatmul.mubr.msk.f32.vlgmr.msra.gmra.mrb[18].mxu1 %vm273_vm2, %v1472_v21 }
 0xd7b   :  { %2397 = vmatpush3.xpose.msk.msra.mxu1 %vm273_vm2, %v1697_v18  ;;  %2398 = vmatprep.mubr.msk.f32.mxu1 %vm2700_vm1, %v2698_v10 }
 0xd7c   :  { %2401 = vmatprep.subr.mxu1 %v2698_v10 }
 0xd7e   :  { %2399 = vmatmul.mubr.msk.f32.vlgmr.msra.gmra.mrb[20].mxu1 %vm273_vm2, %v1695_v22 }
 0xd7f   :  { %2403 = vmatprep.mubr.msk.f32.mxu1 %vm2700_vm1, %v2698_v10 }
 0xddf   :  { %v1384_v23 = vpop.f32.mrb[16].mxu1 }
 0xde0   :  { %v2375_v24 = vpop.f32.mrb[17].mxu1 }
 0xe4d   :  { %v1544_v25 = vpop.f32.mrb[18].mxu1 }
 0xe4e   :  { %v2385_v26 = vpop.f32.mrb[19].mxu1  ;;  %2389 = vmatmul.mubr.msk.f32.vlgmr.msra.gmra.mrb[8].mxu0 %vm273_vm2, %v1544_v25 }
 0xe4f   :  { %2392 = vmatpush3.msra.mxu0 %v2938_v63  ;;  %2393 = vmatprep.mubr.msk.f32.mxu0 %vm2700_vm1, %v2698_v10 }
 0xe50   :  { %2406 = vmatprep.subr.mxu0 %v2698_v10 }
 0xe51   :  { %v1768_v27 = vpop.f32.mrb[20].mxu1 }
 0xe52   :  { %v1769_v28 = vadd.f32 %v1768_v27, %v2899_v31  ;;  %v2400_v29 = vpop.f32.mrb[21].mxu1 }
 0xe54   :  { %v1772_v30 = vsel %vm273_vm2, %v1769_v28, -inf }
 0xe55   :  { %1773 = vmax.xlane.f32.xlu0 %v1772_v30 }
 0xe56   :  { %2394 = vmatmul.mubr.msk.f32.vlgmr.msra.gmra.mrb[8].mxu0 %vm273_vm2, %v1384_v23 }
 0xe57   :  { %2407 = vmatpush3.msra.mxu0 %v2956_v15  ;;  %2408 = vmatprep.mubr.msk.f32.mxu0 %vm2700_vm1, %v2698_v10 }
 0xe58   :  { %2416 = vmatprep.subr.mxu0 %v2698_v10 }
 0xe6b   :  { %1785 = vrot.lane.b32.xlu0 %v2875_v11, %s2706_s20 }
 0xee2   :  { %v1774_v63 = vpop.xlane.xlu0 %1773 }
 0xee3   :  { %v1775_v32 = vsub.f32 %v1769_v28, %v1774_v63 }
 0xee5   :  { %v1776_v33 = vmul.f32 1.442695, %v1775_v32 }
 0xee6   :  { %v1786_v34 = vpop.permute.xlu0 %1785 }
 0xee7   :  { %2492 = vpow2.f32 %v1776_v33  ;;  %2402 = vmatpush3.msra.mxu1 %v1786_v34 }
 0xee8   :  { %2411 = vmatprep.subr.mxu1 %v2698_v10 }
 0xef1   :  { %v2493_v35 = vpop.eup %2492 }
 0xef2   :  { %v1778_v36 = vsel %vm273_vm2, %v2493_v35, 0.0 }
 0xef3   :  { %1779 = vadd.xlane.f32.xlu1 %v1778_v36 }
 0xf04   :  { %1935 = vrot.lane.b32.xlu1 %v2997_v49, %s2707_s21 }
 0xf80   :  { %v1780_v15 = vpop.xlane.xlu1 %1779 }
 0xf81   :  { %2494 = vrcp.f32 %v1780_v15 }
 0xf84   :  { %v1936_v11 = vpop.permute.xlu1 %1935 }
 0xf8b   :  { %v2495_v37 = vpop.eup %2494 }
 0xf8c   :  { %v1782_v38 = vmul.f32 %v2495_v37, %v2493_v35 }
 0xf8e   :  { %1784 = vst.msk [vmem:[#allocation13 + $0x30] sm:$0xff] %vm273_vm2, %v1782_v38  ;;  %2404 = vmatmul.mubr.msk.f32.vlgmr.msra.gmra.mrb[22].mxu1 %vm273_vm2, %v1782_v38 }
 0xf8f   :  { %2412 = vmatpush3.xpose.msk.msra.mxu1 %vm273_vm2, %v1697_v18  ;;  %2413 = vmatprep.mubr.msk.f32.mxu1 %vm2700_vm1, %v2698_v10 }
 0xf92   :  { %2414 = vmatmul.mubr.msk.f32.vlgmr.msra.gmra.mrb[24].mxu1 %vm273_vm2, %v1936_v11 }
0x1061   :  { %v1857_v39 = vpop.f32.mrb[22].mxu1 }
0x1062   :  { %v2405_v40 = vpop.f32.mrb[23].mxu1  ;;  %2409 = vmatmul.mubr.msk.f32.vlgmr.msra.gmra.mrb[8].mxu0 %vm273_vm2, %v1857_v39 }
0x1063   :  { %2417 = vmatpush3.msra.mxu0 %v1786_v34  ;;  %2418 = vmatprep.mubr.msk.f32.mxu0 %vm2700_vm1, %v2698_v10 }
0x1064   :  { %2421 = vmatprep.subr.mxu0 %v2698_v10 }
0x1065   :  { %v2005_v41 = vpop.f32.mrb[24].mxu1 }
0x1066   :  { %v2006_v42 = vadd.f32 %v2005_v41, %v2899_v31  ;;  %v2415_v43 = vpop.f32.mrb[25].mxu1 }
0x1068   :  { %v2009_v44 = vsel %vm273_vm2, %v2006_v42, -inf }
0x1069   :  { %2010 = vmax.xlane.f32.xlu0 %v2009_v44 }
0x10f6   :  { %v2011_v46 = vpop.xlane.xlu0 %2010 }
0x10f7   :  { %v2012_v47 = vsub.f32 %v2006_v42, %v2011_v46 }
0x10f9   :  { %v2013_v48 = vmul.f32 1.442695, %v2012_v47 }
0x10fb   :  { %2496 = vpow2.f32 %v2013_v48 }
0x1105   :  { %v2497_v49 = vpop.eup %2496 }
0x1106   :  { %v2015_v50 = vsel %vm273_vm2, %v2497_v49, 0.0 }
0x1107   :  { %2016 = vadd.xlane.f32.xlu1 %v2015_v50 }
0x1194   :  { %v2017_v51 = vpop.xlane.xlu1 %2016 }
0x1195   :  { %2498 = vrcp.f32 %v2017_v51 }
0x119f   :  { %v2499_v52 = vpop.eup %2498 }
0x11a0   :  { %v2019_v53 = vmul.f32 %v2499_v52, %v2497_v49 }
0x11a2   :  { %2021 = vst.msk [vmem:[#allocation13 + $0x38] sm:$0xff] %vm273_vm2, %v2019_v53  ;;  %2419 = vmatmul.mubr.msk.f32.vlgmr.msra.gmra.mrb[10].mxu0 %vm273_vm2, %v2019_v53 }
0x11a3   :  { %2422 = vmatpush3.msra.mxu0 %v2988_v45  ;;  %2423 = vmatprep.mubr.msk.f32.mxu0 %vm2700_vm1, %v2698_v10 }
0x1275   :  { %v2091_v31 = vpop.f32.mrb[10].mxu0 }
0x1276   :  { %v2420_v54 = vpop.f32.mrb[11].mxu0  ;;  %2424 = vmatmul.mubr.msk.f32.vlgmr.msra.gmra.mrb[8].mxu0 %vm273_vm2, %v2091_v31 }
0x1277   :  { %2643 = shalt.err (!%p2640_p10)
}
0x1278   :  { %s2644_s24 = scalar_lea.hbm %s3119_s7, 1024 }
0x1279   :  { %p2645_p11 = scmp.ne.s32.totalorder %s3119_s7, %s2644_s24  ;;  %p2648_p12 = scmp.lt.u32.totalorder %s2644_s24, %s3119_s7 }
0x127b   :  { %p2650_p13 = pnand %p2648_p12, %p2645_p11 }
0x127d   :  { %2653 = shalt.err (!%p2650_p13)
}
0x127e   :  { %2182 = dma.vmem_to_hbm [thread:$0]  %s2177_s2, 1024, %s3119_s7, [#allocation4], %s2690_s17, %s2690_s17, %s2691_s18  }
0x127f   :  { %s2709_s4 = smov [#allocation14]  }
0x1280   :  { %s2188_s0 = sshll.u32 %s2709_s4, 4  ;;  %s2189_s0 = int_to_ptr.vmem [resolvable:$true] %s2188_s0 }
0x1281   :  { %s2654_s6 = scalar_lea.vmem %s2189_s0, 256  ;;  %p2659_p1 = scmp.lt.s32.totalorder %s2189_s0, %s2189_s0 }
0x1282   :  { %p2655_p0 = scmp.ne.s32.totalorder %s2189_s0, %s2654_s6  ;;  %p2660_p2 = scmp.lt.s32.totalorder %s2654_s6, %s2654_s6 }
0x1284   :  { %p2661_p3 = por %p2660_p2, %p2659_p1 }
0x1286   :  { %p2662_p4 = pnand %p2661_p3, %p2655_p0 }
0x1349   :  { %v2164_v10 = vpop.f32.mrb[8].mxu0 }
0x134a   :  { %2170 = vst.msk [vmem:[#allocation14 + $0x8] sm:$0xff] %vm118_vm0, %v2164_v10  ;;  %v2425_v45 = vpop.f32.mrb[9].mxu0 }
0x134b   :  { %2665 = shalt.err (!%p2662_p4)
}
0x134c   :  { %s2666_s11 = scalar_lea.hbm %s3120_s8, 256 }
0x134d   :  { %p2667_p5 = scmp.ne.s32.totalorder %s3120_s8, %s2666_s11  ;;  %p2670_p6 = scmp.lt.u32.totalorder %s2666_s11, %s3120_s8 }
0x134f   :  { %p2672_p7 = pnand %p2670_p6, %p2667_p5 }
0x1351   :  { %2675 = shalt.err (!%p2672_p7)
}
0x1352   :  { %2194 = dma.vmem_to_hbm [thread:$0]  %s2189_s0, 256, %s3120_s8, [#allocation15], %s2690_s17, %s2690_s17, %s2691_s18  }
0x1353   :  { %2684 = dma.done.wait [#allocation4], 1024  }
0x1354   :  { %2685 = vsyncadd [#allocation4], 4294966272 }
0x1355   :  { %2686 = dma.done.wait [#allocation15], 256  }
0x1356   :  { %2687 = vsyncadd [#allocation15], 4294967040 }
0x1357   :  { %2201 = vsyncpa [#allocation3], 1 }
0x1358   :  { %2202 = vsyncpa [#allocation6], 1 }
0x1359   :  { %2203 = vsyncpa [#allocation9], 1 }
0x135a   :  { %2204 = vsyncpa [#allocation12], 1 }
0x135b   :  { %2205 = vsyncpa [#allocation4], 1 }
0x135c   :  { %2206 = vsyncpa [#allocation15], 1 }

</bundles_post_ra>
